<compile_context>
chip_gen: v7x
topology: tpu7x:2x2x1
jax: 0.10.0
libtpu: 0.0.40
codegen_flags: <defaults>
</compile_context>

<pallas_src>
import functools

import jax
import jax.numpy as jnp
from jax.experimental import pallas as pl
from jax.experimental.pallas import tpu as pltpu

CURVATURE_K = 1.0
LANE = 128
SUBLANE = 8
# Residual blocks are fully unrolled up to this depth; beyond it a lax.fori_loop with
# dynamic first-axis weight indexing is used (bounds live ranges / code size).
UNROLL_MAX_BLOCKS = 4


def _round_up(n, m):
    return ((n + m - 1) // m) * m


# ------------------------------ Pallas kernel ------------------------------ #
def _make_resnet_kernel(num_blocks, k, compute_dtype):
    def kernel(x_ref, w_in_ref, b_in_ref,
               w1s_ref, b1s_ref, w2s_ref, b2s_ref,
               w_out_ref, b_out_ref, o_ref):
        bt = x_ref.shape[0]
        hid_p = w_in_ref.shape[1]
        out_p = o_ref.shape[1]

        # Hoisted column-0 masks (one iota+compare per shape for the whole kernel).
        mask_hid = jax.lax.broadcasted_iota(jnp.int32, (bt, hid_p), 1) == 0
        mask_out = jax.lax.broadcasted_iota(jnp.int32, (bt, out_p), 1) == 0

        def affine(h, w, b):
            # Weights arrive pre-cast to compute_dtype from the wrapper; only the
            # f32 activations are cast here.  f32 accumulation, f32 bias add.
            return jnp.dot(h.astype(compute_dtype), w,
                           preferred_element_type=jnp.float32) + b

        def project(y, mask):
            # time col = sqrt(||space||^2 + k); only column 0 is rewritten.
            # Zero-the-time-column-then-reduce: one XLU reduction, no catastrophic
            # cancellation (vs. sum(y^2) - y0^2); padded lanes are exactly zero.
            space = jnp.where(mask, 0.0, y)
            sumsq_space = jnp.sum(space * space, axis=-1, keepdims=True)
            time = jnp.sqrt(jnp.maximum(sumsq_space + k, 1e-8))
            return jnp.where(mask, time, y)

        def hyp_relu(y, mask):
            # relu on everything; projection overwrites the time column anyway.
            return project(jnp.maximum(y, 0.0), mask)

        def residual_block(h, w1, b1, w2, b2):
            identity = h
            out = hyp_relu(affine(h, w1, b1), mask_hid)
            # fc2's Lorentz projection only touches column 0 of `out`, and column 0
            # of (out + identity) is discarded by the following hyp_relu projection,
            # so skipping it is exactly equivalent to the reference.
            out = affine(out, w2, b2)
            return hyp_relu(out + identity, mask_hid)

        x = x_ref[...]

        # input layer + HypActivation(relu); the linear's own projection is dead
        # work (the activation recomputes column 0 from space coords), skip it.
        h = hyp_relu(affine(x, w_in_ref[...], b_in_ref[...]), mask_hid)

        if num_blocks <= UNROLL_MAX_BLOCKS:
            for blk in range(num_blocks):
                h = residual_block(h, w1s_ref[blk], b1s_ref[blk],
                                   w2s_ref[blk], b2s_ref[blk])
        else:
            def body(blk, h):
                return residual_block(h, w1s_ref[blk], b1s_ref[blk],
                                      w2s_ref[blk], b2s_ref[blk])
            h = jax.lax.fori_loop(0, num_blocks, body, h)

        # output layer: this projection IS the result, keep it.
        o_ref[...] = project(affine(h, w_out_ref[...], b_out_ref[...]), mask_out)

    return kernel


# --------------------------------- wrapper ---------------------------------- #
def _const_spec(arr, single_buffer):
    """BlockSpec for a grid-invariant (fully resident) parameter array."""
    ndim = arr.ndim
    index_map = lambda i, _n=ndim: (0,) * _n
    if single_buffer and hasattr(pl, "Buffered"):
        try:
            # No need to double-buffer params whose block never changes; halves
            # their VMEM residency (matters most on v7x's 64 MiB VMEM).
            return pl.BlockSpec(arr.shape, index_map, pipeline_mode=pl.Buffered(1))
        except Exception:
            pass
    return pl.BlockSpec(arr.shape, index_map)


def fully_connected_resnet(x, params, *, num_blocks, batch_tile=None,
                           compute_dtype=jnp.bfloat16,
                           single_buffer_params=True):
    """x: [B, input_dim] float32.  params: flat list of (W[in,out], b[1,out]).

    compute_dtype controls the MXU operand dtype only (accumulation and all
    elementwise math stay f32).  bf16 is the default on every TPU generation;
    pass compute_dtype=jnp.float32 for strict parity with the f32 module.
    """
    assert num_blocks >= 1
    B, input_dim = x.shape
    hidden_dim = params[0].shape[-1]
    output_dim = params[-1].shape[-1]

    # Lane-dense padded feature dims (zero padding is exact, see header comment).
    in_p = _round_up(input_dim, LANE)
    hid_p = _round_up(hidden_dim, LANE)
    out_p = _round_up(output_dim, LANE)

    # Whole batch in one grid step when small; 512-row tiles when scaled up
    # (amortizes ~0.35us/step grid overhead, fills the 256-row MXU on v6e/v7x).
    # Keep multi-step grids even-length so v7x's two TCs split work evenly.
    if batch_tile is None:
        batch_tile = min(_round_up(B, SUBLANE), 512)
        steps = -(-B // batch_tile)
        if steps > 1 and steps % 2 == 1:
            steps += 1
            batch_tile = _round_up(-(-B // steps), SUBLANE)
    Bp = _round_up(B, batch_tile)
    if (Bp // batch_tile) > 1 and (Bp // batch_tile) % 2 == 1:
        Bp += batch_tile  # one extra all-zero tile keeps the two TCs balanced

    x_p = jnp.pad(x, ((0, Bp - B), (0, in_p - input_dim)))

    def pad2(a, r, c):
        return jnp.pad(a, ((0, r - a.shape[0]), (0, c - a.shape[1])))

    # Weights are cast to compute_dtype ONCE here (halves their DMA bytes / VMEM
    # residency and removes the per-step in-kernel cast).  Biases stay f32: they
    # are added after the f32 accumulation.
    w_in = pad2(params[0], in_p, hid_p).astype(compute_dtype)
    b_in = pad2(params[1], 1, hid_p)
    w1s, b1s, w2s, b2s = [], [], [], []
    for blk in range(num_blocks):
        w1, b1, w2, b2 = params[2 + 4 * blk: 6 + 4 * blk]
        w1s.append(pad2(w1, hid_p, hid_p)); b1s.append(pad2(b1, 1, hid_p))
        w2s.append(pad2(w2, hid_p, hid_p)); b2s.append(pad2(b2, 1, hid_p))
    w1s = jnp.stack(w1s).astype(compute_dtype); b1s = jnp.stack(b1s)
    w2s = jnp.stack(w2s).astype(compute_dtype); b2s = jnp.stack(b2s)
    w_out = pad2(params[-2], hid_p, out_p).astype(compute_dtype)
    b_out = pad2(params[-1], 1, out_p)
    # TODO(synk): add a per-block weight-streaming path (block grid axis or
    # pltpu.emit_pipeline) once (2*num_blocks+2)*hid_p^2*dtype_bytes (x buffers)
    # exceeds ~1/4 of VMEM (v7x: 64 MiB physical / 32 MiB scoped default).

    kernel = _make_resnet_kernel(num_blocks, CURVATURE_K, compute_dtype)

    x_spec = pl.BlockSpec((batch_tile, in_p), lambda i: (i, 0))
    out_spec = pl.BlockSpec((batch_tile, out_p), lambda i: (i, 0))
    # Grid-invariant params: full array resident every step (single-buffered when
    # supported).  VMEM footprint at these shapes is well under 2 MiB.
    param_specs = [_const_spec(a, single_buffer_params)
                   for a in (w_in, b_in, w1s, b1s, w2s, b2s, w_out, b_out)]

    out_padded = pl.pallas_call(
        kernel,
        out_shape=jax.ShapeDtypeStruct((Bp, out_p), jnp.float32),
        grid_spec=pltpu.PrefetchScalarGridSpec(
            num_scalar_prefetch=0,
            grid=(Bp // batch_tile,),
            in_specs=[x_spec] + param_specs,
            out_specs=out_spec,
        ),
        compiler_params=pltpu.CompilerParams(dimension_semantics=("parallel",)),
    )(x_p, w_in, b_in, w1s, b1s, w2s, b2s, w_out, b_out)

    return out_padded[:B, :output_dim]


# --------------------------- pure-JAX reference ----------------------------- #
# Keeps every projection (full assumed Lorentz formulation) -- validates that the
# dropped projections in the kernel are indeed dead work.
def _ref_project(y, k):
    space = y[:, 1:]
    time = jnp.sqrt(jnp.maximum(jnp.sum(space * space, -1, keepdims=True) + k, 1e-8))
    return jnp.concatenate([time, space], axis=-1)


def _ref_forward(x, params, num_blocks, k=CURVATURE_K):
    def lin(h, w, b):
        return _ref_project(h @ w + b, k)

    def act(h):
        return _ref_project(jnp.maximum(h, 0.0), k)

    w_in, b_in = params[0], params[1]
    h = act(lin(x, w_in, b_in))
    for blk in range(num_blocks):
        w1, b1, w2, b2 = params[2 + 4 * blk: 6 + 4 * blk]
        identity = h
        out = act(lin(h, w1, b1))
        out = lin(out, w2, b2)
        h = act(out + identity)
    w_out, b_out = params[-2], params[-1]
    return lin(h, w_out, b_out)


# ---------------------------------- main ------------------------------------ #
def _init_params(key, input_dim, output_dim, hidden_dim, num_blocks):
    """Deterministic synthetic weights (shapes match the PyTorch module)."""
    dims = [(input_dim, hidden_dim)]
    for _ in range(num_blocks):
        dims += [(hidden_dim, hidden_dim), (hidden_dim, hidden_dim)]
    dims += [(hidden_dim, output_dim)]

    params = []
    for (din, dout) in dims:
        key, kw, kb = jax.random.split(key, 3)
        w = jax.random.normal(kw, (din, dout), jnp.float32) * (1.0 / jnp.sqrt(din))
        b = jax.random.normal(kb, (1, dout), jnp.float32) * 0.01
        params += [w, b]
    return params


if __name__ == "__main__":
    batch = 16
    input_dim = 8
    output_dim = 8
    hidden_dim = 32
    num_blocks = 3

    key = jax.random.PRNGKey(0)
    key, kx = jax.random.split(key)
    x = jax.random.normal(kx, (batch, input_dim), jnp.float32)
    params = _init_params(key, input_dim, output_dim, hidden_dim, num_blocks)

    ref = _ref_forward(x, params, num_blocks)

    # Default path: bf16 MXU operands (f32 accumulation / elementwise).  If this
    # jax build rejects pipeline_mode=pl.Buffered(1) on the param specs, fall back
    # to default double-buffered params (identical results, slightly more VMEM).
    single_buffer = True
    run = jax.jit(functools.partial(fully_connected_resnet, num_blocks=num_blocks,
                                    single_buffer_params=True))
    try:
        out_bf16 = jax.block_until_ready(run(x, params))
    except Exception:
        single_buffer = False
        run = jax.jit(functools.partial(fully_connected_resnet, num_blocks=num_blocks,
                                        single_buffer_params=False))
        out_bf16 = jax.block_until_ready(run(x, params))

    assert out_bf16.shape == (batch, output_dim)
    assert bool(jnp.all(jnp.isfinite(out_bf16)))
    rel = float(jnp.linalg.norm(out_bf16 - ref) / jnp.linalg.norm(ref))
    assert rel < 5e-2, f"bf16 path drifted from f32 reference: rel={rel}"

    # Strict f32 path: must match the pure-JAX reference tightly (also validates
    # that the skipped intermediate Lorentz projections are dead work).
    run_f32 = jax.jit(functools.partial(fully_connected_resnet, num_blocks=num_blocks,
                                        compute_dtype=jnp.float32,
                                        single_buffer_params=single_buffer))
    out_f32 = jax.block_until_ready(run_f32(x, params))
    assert jnp.allclose(out_f32, ref, atol=1e-4, rtol=1e-4), "mismatch vs JAX reference"

    # Deeper network exercises the lax.fori_loop + dynamic weight-indexing path.
    deep_blocks = 6
    params_deep = _init_params(jax.random.PRNGKey(1), input_dim, output_dim,
                               hidden_dim, deep_blocks)
    run_deep = jax.jit(functools.partial(fully_connected_resnet,
                                         num_blocks=deep_blocks,
                                         compute_dtype=jnp.float32,
                                         single_buffer_params=single_buffer))
    out_deep = jax.block_until_ready(run_deep(x, params_deep))
    ref_deep = _ref_forward(x, params_deep, deep_blocks)
    rel_deep = float(jnp.linalg.norm(out_deep - ref_deep) / jnp.linalg.norm(ref_deep))
    assert rel_deep < 2e-3, f"deep fori_loop path mismatch: rel={rel_deep}"

    print("KERNEL_OK")
</pallas_src>

<mosaic_0001>
module attributes {stable_mosaic.version = 11 : i64} {
  func.func @kernel(%arg0: i32, %arg1: memref<16x128xf32, #tpu.memory_space<vmem>>, %arg2: memref<128x128xbf16, #tpu.memory_space<vmem>>, %arg3: memref<1x128xf32, #tpu.memory_space<vmem>>, %arg4: memref<3x128x128xbf16, #tpu.memory_space<vmem>>, %arg5: memref<3x1x128xf32, #tpu.memory_space<vmem>>, %arg6: memref<3x128x128xbf16, #tpu.memory_space<vmem>>, %arg7: memref<3x1x128xf32, #tpu.memory_space<vmem>>, %arg8: memref<128x128xbf16, #tpu.memory_space<vmem>>, %arg9: memref<1x128xf32, #tpu.memory_space<vmem>>, %arg10: memref<16x128xf32, #tpu.memory_space<vmem>>) attributes {dimension_semantics = [#tpu.dimension_semantics<parallel>], iteration_bounds = array<i64: 1>, scalar_prefetch = 0 : i64, scratch_operands = 0 : i64, tpu.core_type = #tpu.core_type<tc>, window_params = [{transform_indices = @transform_0, window_bounds = array<i64: 16, 128>}, {pipeline_mode = #tpu.pipeline_mode<synchronous>, transform_indices = @transform_1, window_bounds = array<i64: 128, 128>}, {pipeline_mode = #tpu.pipeline_mode<synchronous>, transform_indices = @transform_2, window_bounds = array<i64: 1, 128>}, {pipeline_mode = #tpu.pipeline_mode<synchronous>, transform_indices = @transform_3, window_bounds = array<i64: 3, 128, 128>}, {pipeline_mode = #tpu.pipeline_mode<synchronous>, transform_indices = @transform_4, window_bounds = array<i64: 3, 1, 128>}, {pipeline_mode = #tpu.pipeline_mode<synchronous>, transform_indices = @transform_5, window_bounds = array<i64: 3, 128, 128>}, {pipeline_mode = #tpu.pipeline_mode<synchronous>, transform_indices = @transform_6, window_bounds = array<i64: 3, 1, 128>}, {pipeline_mode = #tpu.pipeline_mode<synchronous>, transform_indices = @transform_7, window_bounds = array<i64: 128, 128>}, {pipeline_mode = #tpu.pipeline_mode<synchronous>, transform_indices = @transform_8, window_bounds = array<i64: 1, 128>}, {transform_indices = @transform_9, window_bounds = array<i64: 16, 128>}]} {
    %0 = tpu.iota {dimensions = array<i32: 1>} : vector<16x128xi32>
    %c0_i32 = arith.constant 0 : i32
    %1 = vector.broadcast %c0_i32 : i32 to vector<16x128xi32>
    %2 = arith.cmpi eq, %0, %1 : vector<16x128xi32>
    %3 = tpu.iota {dimensions = array<i32: 1>} : vector<16x128xi32>
    %c0_i32_0 = arith.constant 0 : i32
    %4 = vector.broadcast %c0_i32_0 : i32 to vector<16x128xi32>
    %5 = arith.cmpi eq, %3, %4 : vector<16x128xi32>
    %c0 = arith.constant 0 : index
    %c0_1 = arith.constant 0 : index
    %6 = vector.load %arg1[%c0, %c0_1] : memref<16x128xf32, #tpu.memory_space<vmem>>, vector<16x128xf32>
    %c0_2 = arith.constant 0 : index
    %c0_3 = arith.constant 0 : index
    %7 = vector.load %arg2[%c0_2, %c0_3] : memref<128x128xbf16, #tpu.memory_space<vmem>>, vector<128x128xbf16>
    %c0_4 = arith.constant 0 : index
    %c0_5 = arith.constant 0 : index
    %8 = vector.load %arg3[%c0_4, %c0_5] : memref<1x128xf32, #tpu.memory_space<vmem>>, vector<1x128xf32>
    %9 = arith.truncf %6 : vector<16x128xf32> to vector<16x128xbf16>
    %cst = arith.constant dense<0.000000e+00> : vector<16x128xf32>
    %10 = tpu.matmul %9, %7, %cst {dimension_numbers = #tpu.dot_dimension_numbers<[1], [0], [0], [1], [0, 0, 1, 1], [], []>} : vector<16x128xbf16>, vector<128x128xbf16>, vector<16x128xf32> -> vector<16x128xf32>
    %11 = vector.broadcast %8 : vector<1x128xf32> to vector<16x128xf32>
    %12 = arith.addf %10, %11 : vector<16x128xf32>
    %cst_6 = arith.constant 0.000000e+00 : f32
    %13 = vector.broadcast %cst_6 : f32 to vector<16x128xf32>
    %14 = arith.maximumf %12, %13 : vector<16x128xf32>
    %cst_7 = arith.constant 0.000000e+00 : f32
    %15 = vector.broadcast %cst_7 : f32 to vector<16x128xf32>
    %16 = arith.select %2, %15, %14 : vector<16x128xi1>, vector<16x128xf32>
    %17 = arith.mulf %16, %16 : vector<16x128xf32>
    %cst_8 = arith.constant dense<0.000000e+00> : vector<16xf32>
    %18 = vector.multi_reduction <add>, %17, %cst_8 [1] : vector<16x128xf32> to vector<16xf32>
    %19 = vector.shape_cast %18 : vector<16xf32> to vector<16x1xf32>
    %cst_9 = arith.constant 1.000000e+00 : f32
    %20 = vector.broadcast %cst_9 : f32 to vector<16x1xf32>
    %21 = arith.addf %19, %20 : vector<16x1xf32>
    %cst_10 = arith.constant 9.99999993E-9 : f32
    %22 = vector.broadcast %cst_10 : f32 to vector<16x1xf32>
    %23 = arith.maximumf %21, %22 : vector<16x1xf32>
    %24 = math.sqrt %23 : vector<16x1xf32>
    %25 = vector.shape_cast %24 : vector<16x1xf32> to vector<16x1xf32>
    %26 = vector.broadcast %25 : vector<16x1xf32> to vector<16x128xf32>
    %27 = arith.select %2, %26, %14 : vector<16x128xi1>, vector<16x128xf32>
    %c0_11 = arith.constant 0 : index
    %c0_12 = arith.constant 0 : index
    %c0_13 = arith.constant 0 : index
    %28 = vector.load %arg4[%c0_11, %c0_12, %c0_13] : memref<3x128x128xbf16, #tpu.memory_space<vmem>>, vector<1x128x128xbf16>
    %29 = vector.shape_cast %28 : vector<1x128x128xbf16> to vector<128x128xbf16>
    %c0_14 = arith.constant 0 : index
    %c0_15 = arith.constant 0 : index
    %c0_16 = arith.constant 0 : index
    %30 = vector.load %arg5[%c0_14, %c0_15, %c0_16] : memref<3x1x128xf32, #tpu.memory_space<vmem>>, vector<1x1x128xf32>
    %31 = vector.shape_cast %30 : vector<1x1x128xf32> to vector<1x128xf32>
    %c0_17 = arith.constant 0 : index
    %c0_18 = arith.constant 0 : index
    %c0_19 = arith.constant 0 : index
    %32 = vector.load %arg6[%c0_17, %c0_18, %c0_19] : memref<3x128x128xbf16, #tpu.memory_space<vmem>>, vector<1x128x128xbf16>
    %33 = vector.shape_cast %32 : vector<1x128x128xbf16> to vector<128x128xbf16>
    %c0_20 = arith.constant 0 : index
    %c0_21 = arith.constant 0 : index
    %c0_22 = arith.constant 0 : index
    %34 = vector.load %arg7[%c0_20, %c0_21, %c0_22] : memref<3x1x128xf32, #tpu.memory_space<vmem>>, vector<1x1x128xf32>
    %35 = vector.shape_cast %34 : vector<1x1x128xf32> to vector<1x128xf32>
    %36 = arith.truncf %27 : vector<16x128xf32> to vector<16x128xbf16>
    %cst_23 = arith.constant dense<0.000000e+00> : vector<16x128xf32>
    %37 = tpu.matmul %36, %29, %cst_23 {dimension_numbers = #tpu.dot_dimension_numbers<[1], [0], [0], [1], [0, 0, 1, 1], [], []>} : vector<16x128xbf16>, vector<128x128xbf16>, vector<16x128xf32> -> vector<16x128xf32>
    %38 = vector.broadcast %31 : vector<1x128xf32> to vector<16x128xf32>
    %39 = arith.addf %37, %38 : vector<16x128xf32>
    %cst_24 = arith.constant 0.000000e+00 : f32
    %40 = vector.broadcast %cst_24 : f32 to vector<16x128xf32>
    %41 = arith.maximumf %39, %40 : vector<16x128xf32>
    %cst_25 = arith.constant 0.000000e+00 : f32
    %42 = vector.broadcast %cst_25 : f32 to vector<16x128xf32>
    %43 = arith.select %2, %42, %41 : vector<16x128xi1>, vector<16x128xf32>
    %44 = arith.mulf %43, %43 : vector<16x128xf32>
    %cst_26 = arith.constant dense<0.000000e+00> : vector<16xf32>
    %45 = vector.multi_reduction <add>, %44, %cst_26 [1] : vector<16x128xf32> to vector<16xf32>
    %46 = vector.shape_cast %45 : vector<16xf32> to vector<16x1xf32>
    %cst_27 = arith.constant 1.000000e+00 : f32
    %47 = vector.broadcast %cst_27 : f32 to vector<16x1xf32>
    %48 = arith.addf %46, %47 : vector<16x1xf32>
    %cst_28 = arith.constant 9.99999993E-9 : f32
    %49 = vector.broadcast %cst_28 : f32 to vector<16x1xf32>
    %50 = arith.maximumf %48, %49 : vector<16x1xf32>
    %51 = math.sqrt %50 : vector<16x1xf32>
    %52 = vector.shape_cast %51 : vector<16x1xf32> to vector<16x1xf32>
    %53 = vector.broadcast %52 : vector<16x1xf32> to vector<16x128xf32>
    %54 = arith.select %2, %53, %41 : vector<16x128xi1>, vector<16x128xf32>
    %55 = arith.truncf %54 : vector<16x128xf32> to vector<16x128xbf16>
    %cst_29 = arith.constant dense<0.000000e+00> : vector<16x128xf32>
    %56 = tpu.matmul %55, %33, %cst_29 {dimension_numbers = #tpu.dot_dimension_numbers<[1], [0], [0], [1], [0, 0, 1, 1], [], []>} : vector<16x128xbf16>, vector<128x128xbf16>, vector<16x128xf32> -> vector<16x128xf32>
    %57 = vector.broadcast %35 : vector<1x128xf32> to vector<16x128xf32>
    %58 = arith.addf %56, %57 : vector<16x128xf32>
    %59 = arith.addf %58, %27 : vector<16x128xf32>
    %cst_30 = arith.constant 0.000000e+00 : f32
    %60 = vector.broadcast %cst_30 : f32 to vector<16x128xf32>
    %61 = arith.maximumf %59, %60 : vector<16x128xf32>
    %cst_31 = arith.constant 0.000000e+00 : f32
    %62 = vector.broadcast %cst_31 : f32 to vector<16x128xf32>
    %63 = arith.select %2, %62, %61 : vector<16x128xi1>, vector<16x128xf32>
    %64 = arith.mulf %63, %63 : vector<16x128xf32>
    %cst_32 = arith.constant dense<0.000000e+00> : vector<16xf32>
    %65 = vector.multi_reduction <add>, %64, %cst_32 [1] : vector<16x128xf32> to vector<16xf32>
    %66 = vector.shape_cast %65 : vector<16xf32> to vector<16x1xf32>
    %cst_33 = arith.constant 1.000000e+00 : f32
    %67 = vector.broadcast %cst_33 : f32 to vector<16x1xf32>
    %68 = arith.addf %66, %67 : vector<16x1xf32>
    %cst_34 = arith.constant 9.99999993E-9 : f32
    %69 = vector.broadcast %cst_34 : f32 to vector<16x1xf32>
    %70 = arith.maximumf %68, %69 : vector<16x1xf32>
    %71 = math.sqrt %70 : vector<16x1xf32>
    %72 = vector.shape_cast %71 : vector<16x1xf32> to vector<16x1xf32>
    %73 = vector.broadcast %72 : vector<16x1xf32> to vector<16x128xf32>
    %74 = arith.select %2, %73, %61 : vector<16x128xi1>, vector<16x128xf32>
    %c1 = arith.constant 1 : index
    %c0_35 = arith.constant 0 : index
    %c0_36 = arith.constant 0 : index
    %75 = vector.load %arg4[%c1, %c0_35, %c0_36] : memref<3x128x128xbf16, #tpu.memory_space<vmem>>, vector<1x128x128xbf16>
    %76 = vector.shape_cast %75 : vector<1x128x128xbf16> to vector<128x128xbf16>
    %c1_37 = arith.constant 1 : index
    %c0_38 = arith.constant 0 : index
    %c0_39 = arith.constant 0 : index
    %77 = vector.load %arg5[%c1_37, %c0_38, %c0_39] : memref<3x1x128xf32, #tpu.memory_space<vmem>>, vector<1x1x128xf32>
    %78 = vector.shape_cast %77 : vector<1x1x128xf32> to vector<1x128xf32>
    %c1_40 = arith.constant 1 : index
    %c0_41 = arith.constant 0 : index
    %c0_42 = arith.constant 0 : index
    %79 = vector.load %arg6[%c1_40, %c0_41, %c0_42] : memref<3x128x128xbf16, #tpu.memory_space<vmem>>, vector<1x128x128xbf16>
    %80 = vector.shape_cast %79 : vector<1x128x128xbf16> to vector<128x128xbf16>
    %c1_43 = arith.constant 1 : index
    %c0_44 = arith.constant 0 : index
    %c0_45 = arith.constant 0 : index
    %81 = vector.load %arg7[%c1_43, %c0_44, %c0_45] : memref<3x1x128xf32, #tpu.memory_space<vmem>>, vector<1x1x128xf32>
    %82 = vector.shape_cast %81 : vector<1x1x128xf32> to vector<1x128xf32>
    %83 = arith.truncf %74 : vector<16x128xf32> to vector<16x128xbf16>
    %cst_46 = arith.constant dense<0.000000e+00> : vector<16x128xf32>
    %84 = tpu.matmul %83, %76, %cst_46 {dimension_numbers = #tpu.dot_dimension_numbers<[1], [0], [0], [1], [0, 0, 1, 1], [], []>} : vector<16x128xbf16>, vector<128x128xbf16>, vector<16x128xf32> -> vector<16x128xf32>
    %85 = vector.broadcast %78 : vector<1x128xf32> to vector<16x128xf32>
    %86 = arith.addf %84, %85 : vector<16x128xf32>
    %cst_47 = arith.constant 0.000000e+00 : f32
    %87 = vector.broadcast %cst_47 : f32 to vector<16x128xf32>
    %88 = arith.maximumf %86, %87 : vector<16x128xf32>
    %cst_48 = arith.constant 0.000000e+00 : f32
    %89 = vector.broadcast %cst_48 : f32 to vector<16x128xf32>
    %90 = arith.select %2, %89, %88 : vector<16x128xi1>, vector<16x128xf32>
    %91 = arith.mulf %90, %90 : vector<16x128xf32>
    %cst_49 = arith.constant dense<0.000000e+00> : vector<16xf32>
    %92 = vector.multi_reduction <add>, %91, %cst_49 [1] : vector<16x128xf32> to vector<16xf32>
    %93 = vector.shape_cast %92 : vector<16xf32> to vector<16x1xf32>
    %cst_50 = arith.constant 1.000000e+00 : f32
    %94 = vector.broadcast %cst_50 : f32 to vector<16x1xf32>
    %95 = arith.addf %93, %94 : vector<16x1xf32>
    %cst_51 = arith.constant 9.99999993E-9 : f32
    %96 = vector.broadcast %cst_51 : f32 to vector<16x1xf32>
    %97 = arith.maximumf %95, %96 : vector<16x1xf32>
    %98 = math.sqrt %97 : vector<16x1xf32>
    %99 = vector.shape_cast %98 : vector<16x1xf32> to vector<16x1xf32>
    %100 = vector.broadcast %99 : vector<16x1xf32> to vector<16x128xf32>
    %101 = arith.select %2, %100, %88 : vector<16x128xi1>, vector<16x128xf32>
    %102 = arith.truncf %101 : vector<16x128xf32> to vector<16x128xbf16>
    %cst_52 = arith.constant dense<0.000000e+00> : vector<16x128xf32>
    %103 = tpu.matmul %102, %80, %cst_52 {dimension_numbers = #tpu.dot_dimension_numbers<[1], [0], [0], [1], [0, 0, 1, 1], [], []>} : vector<16x128xbf16>, vector<128x128xbf16>, vector<16x128xf32> -> vector<16x128xf32>
    %104 = vector.broadcast %82 : vector<1x128xf32> to vector<16x128xf32>
    %105 = arith.addf %103, %104 : vector<16x128xf32>
    %106 = arith.addf %105, %74 : vector<16x128xf32>
    %cst_53 = arith.constant 0.000000e+00 : f32
    %107 = vector.broadcast %cst_53 : f32 to vector<16x128xf32>
    %108 = arith.maximumf %106, %107 : vector<16x128xf32>
    %cst_54 = arith.constant 0.000000e+00 : f32
    %109 = vector.broadcast %cst_54 : f32 to vector<16x128xf32>
    %110 = arith.select %2, %109, %108 : vector<16x128xi1>, vector<16x128xf32>
    %111 = arith.mulf %110, %110 : vector<16x128xf32>
    %cst_55 = arith.constant dense<0.000000e+00> : vector<16xf32>
    %112 = vector.multi_reduction <add>, %111, %cst_55 [1] : vector<16x128xf32> to vector<16xf32>
    %113 = vector.shape_cast %112 : vector<16xf32> to vector<16x1xf32>
    %cst_56 = arith.constant 1.000000e+00 : f32
    %114 = vector.broadcast %cst_56 : f32 to vector<16x1xf32>
    %115 = arith.addf %113, %114 : vector<16x1xf32>
    %cst_57 = arith.constant 9.99999993E-9 : f32
    %116 = vector.broadcast %cst_57 : f32 to vector<16x1xf32>
    %117 = arith.maximumf %115, %116 : vector<16x1xf32>
    %118 = math.sqrt %117 : vector<16x1xf32>
    %119 = vector.shape_cast %118 : vector<16x1xf32> to vector<16x1xf32>
    %120 = vector.broadcast %119 : vector<16x1xf32> to vector<16x128xf32>
    %121 = arith.select %2, %120, %108 : vector<16x128xi1>, vector<16x128xf32>
    %c2 = arith.constant 2 : index
    %c0_58 = arith.constant 0 : index
    %c0_59 = arith.constant 0 : index
    %122 = vector.load %arg4[%c2, %c0_58, %c0_59] : memref<3x128x128xbf16, #tpu.memory_space<vmem>>, vector<1x128x128xbf16>
    %123 = vector.shape_cast %122 : vector<1x128x128xbf16> to vector<128x128xbf16>
    %c2_60 = arith.constant 2 : index
    %c0_61 = arith.constant 0 : index
    %c0_62 = arith.constant 0 : index
    %124 = vector.load %arg5[%c2_60, %c0_61, %c0_62] : memref<3x1x128xf32, #tpu.memory_space<vmem>>, vector<1x1x128xf32>
    %125 = vector.shape_cast %124 : vector<1x1x128xf32> to vector<1x128xf32>
    %c2_63 = arith.constant 2 : index
    %c0_64 = arith.constant 0 : index
    %c0_65 = arith.constant 0 : index
    %126 = vector.load %arg6[%c2_63, %c0_64, %c0_65] : memref<3x128x128xbf16, #tpu.memory_space<vmem>>, vector<1x128x128xbf16>
    %127 = vector.shape_cast %126 : vector<1x128x128xbf16> to vector<128x128xbf16>
    %c2_66 = arith.constant 2 : index
    %c0_67 = arith.constant 0 : index
    %c0_68 = arith.constant 0 : index
    %128 = vector.load %arg7[%c2_66, %c0_67, %c0_68] : memref<3x1x128xf32, #tpu.memory_space<vmem>>, vector<1x1x128xf32>
    %129 = vector.shape_cast %128 : vector<1x1x128xf32> to vector<1x128xf32>
    %130 = arith.truncf %121 : vector<16x128xf32> to vector<16x128xbf16>
    %cst_69 = arith.constant dense<0.000000e+00> : vector<16x128xf32>
    %131 = tpu.matmul %130, %123, %cst_69 {dimension_numbers = #tpu.dot_dimension_numbers<[1], [0], [0], [1], [0, 0, 1, 1], [], []>} : vector<16x128xbf16>, vector<128x128xbf16>, vector<16x128xf32> -> vector<16x128xf32>
    %132 = vector.broadcast %125 : vector<1x128xf32> to vector<16x128xf32>
    %133 = arith.addf %131, %132 : vector<16x128xf32>
    %cst_70 = arith.constant 0.000000e+00 : f32
    %134 = vector.broadcast %cst_70 : f32 to vector<16x128xf32>
    %135 = arith.maximumf %133, %134 : vector<16x128xf32>
    %cst_71 = arith.constant 0.000000e+00 : f32
    %136 = vector.broadcast %cst_71 : f32 to vector<16x128xf32>
    %137 = arith.select %2, %136, %135 : vector<16x128xi1>, vector<16x128xf32>
    %138 = arith.mulf %137, %137 : vector<16x128xf32>
    %cst_72 = arith.constant dense<0.000000e+00> : vector<16xf32>
    %139 = vector.multi_reduction <add>, %138, %cst_72 [1] : vector<16x128xf32> to vector<16xf32>
    %140 = vector.shape_cast %139 : vector<16xf32> to vector<16x1xf32>
    %cst_73 = arith.constant 1.000000e+00 : f32
    %141 = vector.broadcast %cst_73 : f32 to vector<16x1xf32>
    %142 = arith.addf %140, %141 : vector<16x1xf32>
    %cst_74 = arith.constant 9.99999993E-9 : f32
    %143 = vector.broadcast %cst_74 : f32 to vector<16x1xf32>
    %144 = arith.maximumf %142, %143 : vector<16x1xf32>
    %145 = math.sqrt %144 : vector<16x1xf32>
    %146 = vector.shape_cast %145 : vector<16x1xf32> to vector<16x1xf32>
    %147 = vector.broadcast %146 : vector<16x1xf32> to vector<16x128xf32>
    %148 = arith.select %2, %147, %135 : vector<16x128xi1>, vector<16x128xf32>
    %149 = arith.truncf %148 : vector<16x128xf32> to vector<16x128xbf16>
    %cst_75 = arith.constant dense<0.000000e+00> : vector<16x128xf32>
    %150 = tpu.matmul %149, %127, %cst_75 {dimension_numbers = #tpu.dot_dimension_numbers<[1], [0], [0], [1], [0, 0, 1, 1], [], []>} : vector<16x128xbf16>, vector<128x128xbf16>, vector<16x128xf32> -> vector<16x128xf32>
    %151 = vector.broadcast %129 : vector<1x128xf32> to vector<16x128xf32>
    %152 = arith.addf %150, %151 : vector<16x128xf32>
    %153 = arith.addf %152, %121 : vector<16x128xf32>
    %cst_76 = arith.constant 0.000000e+00 : f32
    %154 = vector.broadcast %cst_76 : f32 to vector<16x128xf32>
    %155 = arith.maximumf %153, %154 : vector<16x128xf32>
    %cst_77 = arith.constant 0.000000e+00 : f32
    %156 = vector.broadcast %cst_77 : f32 to vector<16x128xf32>
    %157 = arith.select %2, %156, %155 : vector<16x128xi1>, vector<16x128xf32>
    %158 = arith.mulf %157, %157 : vector<16x128xf32>
    %cst_78 = arith.constant dense<0.000000e+00> : vector<16xf32>
    %159 = vector.multi_reduction <add>, %158, %cst_78 [1] : vector<16x128xf32> to vector<16xf32>
    %160 = vector.shape_cast %159 : vector<16xf32> to vector<16x1xf32>
    %cst_79 = arith.constant 1.000000e+00 : f32
    %161 = vector.broadcast %cst_79 : f32 to vector<16x1xf32>
    %162 = arith.addf %160, %161 : vector<16x1xf32>
    %cst_80 = arith.constant 9.99999993E-9 : f32
    %163 = vector.broadcast %cst_80 : f32 to vector<16x1xf32>
    %164 = arith.maximumf %162, %163 : vector<16x1xf32>
    %165 = math.sqrt %164 : vector<16x1xf32>
    %166 = vector.shape_cast %165 : vector<16x1xf32> to vector<16x1xf32>
    %167 = vector.broadcast %166 : vector<16x1xf32> to vector<16x128xf32>
    %168 = arith.select %2, %167, %155 : vector<16x128xi1>, vector<16x128xf32>
    %c0_81 = arith.constant 0 : index
    %c0_82 = arith.constant 0 : index
    %169 = vector.load %arg8[%c0_81, %c0_82] : memref<128x128xbf16, #tpu.memory_space<vmem>>, vector<128x128xbf16>
    %c0_83 = arith.constant 0 : index
    %c0_84 = arith.constant 0 : index
    %170 = vector.load %arg9[%c0_83, %c0_84] : memref<1x128xf32, #tpu.memory_space<vmem>>, vector<1x128xf32>
    %171 = arith.truncf %168 : vector<16x128xf32> to vector<16x128xbf16>
    %cst_85 = arith.constant dense<0.000000e+00> : vector<16x128xf32>
    %172 = tpu.matmul %171, %169, %cst_85 {dimension_numbers = #tpu.dot_dimension_numbers<[1], [0], [0], [1], [0, 0, 1, 1], [], []>} : vector<16x128xbf16>, vector<128x128xbf16>, vector<16x128xf32> -> vector<16x128xf32>
    %173 = vector.broadcast %170 : vector<1x128xf32> to vector<16x128xf32>
    %174 = arith.addf %172, %173 : vector<16x128xf32>
    %cst_86 = arith.constant 0.000000e+00 : f32
    %175 = vector.broadcast %cst_86 : f32 to vector<16x128xf32>
    %176 = arith.select %5, %175, %174 : vector<16x128xi1>, vector<16x128xf32>
    %177 = arith.mulf %176, %176 : vector<16x128xf32>
    %cst_87 = arith.constant dense<0.000000e+00> : vector<16xf32>
    %178 = vector.multi_reduction <add>, %177, %cst_87 [1] : vector<16x128xf32> to vector<16xf32>
    %179 = vector.shape_cast %178 : vector<16xf32> to vector<16x1xf32>
    %cst_88 = arith.constant 1.000000e+00 : f32
    %180 = vector.broadcast %cst_88 : f32 to vector<16x1xf32>
    %181 = arith.addf %179, %180 : vector<16x1xf32>
    %cst_89 = arith.constant 9.99999993E-9 : f32
    %182 = vector.broadcast %cst_89 : f32 to vector<16x1xf32>
    %183 = arith.maximumf %181, %182 : vector<16x1xf32>
    %184 = math.sqrt %183 : vector<16x1xf32>
    %185 = vector.shape_cast %184 : vector<16x1xf32> to vector<16x1xf32>
    %186 = vector.broadcast %185 : vector<16x1xf32> to vector<16x128xf32>
    %187 = arith.select %5, %186, %174 : vector<16x128xi1>, vector<16x128xf32>
    %c0_90 = arith.constant 0 : index
    %c0_91 = arith.constant 0 : index
    %188 = vector.load %arg10[%c0_90, %c0_91] : memref<16x128xf32, #tpu.memory_space<vmem>>, vector<16x128xf32>
    tpu.vector_store %arg10[%c0_90, %c0_91], %187 {strides = array<i32>} : memref<16x128xf32, #tpu.memory_space<vmem>>, vector<16x128xf32>,
    return
  }
  func.func @transform_0(%arg0: i32) -> (i32, i32) {
    %c0_i32 = arith.constant 0 : i32
    %c0_i32_0 = arith.constant 0 : i32
    return %arg0, %c0_i32 : i32, i32
  }
  func.func @transform_1(%arg0: i32) -> (i32, i32) {
    %c0_i32 = arith.constant 0 : i32
    %c0_i32_0 = arith.constant 0 : i32
    %c0_i32_1 = arith.constant 0 : i32
    return %c0_i32, %c0_i32_0 : i32, i32
  }
  func.func @transform_2(%arg0: i32) -> (i32, i32) {
    %c0_i32 = arith.constant 0 : i32
    %c0_i32_0 = arith.constant 0 : i32
    %c0_i32_1 = arith.constant 0 : i32
    return %c0_i32, %c0_i32_0 : i32, i32
  }
  func.func @transform_3(%arg0: i32) -> (i32, i32, i32) {
    %c0_i32 = arith.constant 0 : i32
    %c0_i32_0 = arith.constant 0 : i32
    %c0_i32_1 = arith.constant 0 : i32
    %c0_i32_2 = arith.constant 0 : i32
    return %c0_i32, %c0_i32_0, %c0_i32_1 : i32, i32, i32
  }
  func.func @transform_4(%arg0: i32) -> (i32, i32, i32) {
    %c0_i32 = arith.constant 0 : i32
    %c0_i32_0 = arith.constant 0 : i32
    %c0_i32_1 = arith.constant 0 : i32
    %c0_i32_2 = arith.constant 0 : i32
    return %c0_i32, %c0_i32_0, %c0_i32_1 : i32, i32, i32
  }
  func.func @transform_5(%arg0: i32) -> (i32, i32, i32) {
    %c0_i32 = arith.constant 0 : i32
    %c0_i32_0 = arith.constant 0 : i32
    %c0_i32_1 = arith.constant 0 : i32
    %c0_i32_2 = arith.constant 0 : i32
    return %c0_i32, %c0_i32_0, %c0_i32_1 : i32, i32, i32
  }
  func.func @transform_6(%arg0: i32) -> (i32, i32, i32) {
    %c0_i32 = arith.constant 0 : i32
    %c0_i32_0 = arith.constant 0 : i32
    %c0_i32_1 = arith.constant 0 : i32
    %c0_i32_2 = arith.constant 0 : i32
    return %c0_i32, %c0_i32_0, %c0_i32_1 : i32, i32, i32
  }
  func.func @transform_7(%arg0: i32) -> (i32, i32) {
    %c0_i32 = arith.constant 0 : i32
    %c0_i32_0 = arith.constant 0 : i32
    %c0_i32_1 = arith.constant 0 : i32
    return %c0_i32, %c0_i32_0 : i32, i32
  }
  func.func @transform_8(%arg0: i32) -> (i32, i32) {
    %c0_i32 = arith.constant 0 : i32
    %c0_i32_0 = arith.constant 0 : i32
    %c0_i32_1 = arith.constant 0 : i32
    return %c0_i32, %c0_i32_0 : i32, i32
  }
  func.func @transform_9(%arg0: i32) -> (i32, i32) {
    %c0_i32 = arith.constant 0 : i32
    %c0_i32_0 = arith.constant 0 : i32
    return %arg0, %c0_i32 : i32, i32
  }
}

module attributes {stable_mosaic.version = 11 : i64} {
  func.func @kernel(%arg0: i32, %arg1: memref<16x128xf32, #tpu.memory_space<vmem>>, %arg2: memref<128x128xbf16, #tpu.memory_space<vmem>>, %arg3: memref<1x128xf32, #tpu.memory_space<vmem>>, %arg4: memref<3x128x128xbf16, #tpu.memory_space<vmem>>, %arg5: memref<3x1x128xf32, #tpu.memory_space<vmem>>, %arg6: memref<3x128x128xbf16, #tpu.memory_space<vmem>>, %arg7: memref<3x1x128xf32, #tpu.memory_space<vmem>>, %arg8: memref<128x128xbf16, #tpu.memory_space<vmem>>, %arg9: memref<1x128xf32, #tpu.memory_space<vmem>>, %arg10: memref<16x128xf32, #tpu.memory_space<vmem>>) attributes {dimension_semantics = [#tpu.dimension_semantics<parallel>], iteration_bounds = array<i64: 1>, scalar_prefetch = 0 : i64, scratch_operands = 0 : i64, tpu.core_type = #tpu.core_type<tc>, window_params = [{transform_indices = @transform_0, window_bounds = array<i64: 16, 128>}, {pipeline_mode = #tpu.pipeline_mode<synchronous>, transform_indices = @transform_1, window_bounds = array<i64: 128, 128>}, {pipeline_mode = #tpu.pipeline_mode<synchronous>, transform_indices = @transform_2, window_bounds = array<i64: 1, 128>}, {pipeline_mode = #tpu.pipeline_mode<synchronous>, transform_indices = @transform_3, window_bounds = array<i64: 3, 128, 128>}, {pipeline_mode = #tpu.pipeline_mode<synchronous>, transform_indices = @transform_4, window_bounds = array<i64: 3, 1, 128>}, {pipeline_mode = #tpu.pipeline_mode<synchronous>, transform_indices = @transform_5, window_bounds = array<i64: 3, 128, 128>}, {pipeline_mode = #tpu.pipeline_mode<synchronous>, transform_indices = @transform_6, window_bounds = array<i64: 3, 1, 128>}, {pipeline_mode = #tpu.pipeline_mode<synchronous>, transform_indices = @transform_7, window_bounds = array<i64: 128, 128>}, {pipeline_mode = #tpu.pipeline_mode<synchronous>, transform_indices = @transform_8, window_bounds = array<i64: 1, 128>}, {transform_indices = @transform_9, window_bounds = array<i64: 16, 128>}]} {
    %0 = tpu.iota {dimensions = array<i32: 1>} : vector<16x128xi32>
    %c0_i32 = arith.constant 0 : i32
    %1 = vector.broadcast %c0_i32 : i32 to vector<16x128xi32>
    %2 = arith.cmpi eq, %0, %1 : vector<16x128xi32>
    %3 = tpu.iota {dimensions = array<i32: 1>} : vector<16x128xi32>
    %c0_i32_0 = arith.constant 0 : i32
    %4 = vector.broadcast %c0_i32_0 : i32 to vector<16x128xi32>
    %5 = arith.cmpi eq, %3, %4 : vector<16x128xi32>
    %c0 = arith.constant 0 : index
    %c0_1 = arith.constant 0 : index
    %6 = vector.load %arg1[%c0, %c0_1] : memref<16x128xf32, #tpu.memory_space<vmem>>, vector<16x128xf32>
    %c0_2 = arith.constant 0 : index
    %c0_3 = arith.constant 0 : index
    %7 = vector.load %arg2[%c0_2, %c0_3] : memref<128x128xbf16, #tpu.memory_space<vmem>>, vector<128x128xbf16>
    %c0_4 = arith.constant 0 : index
    %c0_5 = arith.constant 0 : index
    %8 = vector.load %arg3[%c0_4, %c0_5] : memref<1x128xf32, #tpu.memory_space<vmem>>, vector<1x128xf32>
    %9 = arith.truncf %6 : vector<16x128xf32> to vector<16x128xbf16>
    %cst = arith.constant dense<0.000000e+00> : vector<16x128xf32>
    %10 = tpu.matmul %9, %7, %cst {dimension_numbers = #tpu.dot_dimension_numbers<[1], [0], [0], [1], [0, 0, 1, 1], [], []>} : vector<16x128xbf16>, vector<128x128xbf16>, vector<16x128xf32> -> vector<16x128xf32>
    %11 = vector.broadcast %8 : vector<1x128xf32> to vector<16x128xf32>
    %12 = arith.addf %10, %11 : vector<16x128xf32>
    %cst_6 = arith.constant 0.000000e+00 : f32
    %13 = vector.broadcast %cst_6 : f32 to vector<16x128xf32>
    %14 = arith.maximumf %12, %13 : vector<16x128xf32>
    %cst_7 = arith.constant 0.000000e+00 : f32
    %15 = vector.broadcast %cst_7 : f32 to vector<16x128xf32>
    %16 = arith.select %2, %15, %14 : vector<16x128xi1>, vector<16x128xf32>
    %17 = arith.mulf %16, %16 : vector<16x128xf32>
    %cst_8 = arith.constant dense<0.000000e+00> : vector<16xf32>
    %18 = vector.multi_reduction <add>, %17, %cst_8 [1] : vector<16x128xf32> to vector<16xf32>
    %19 = vector.shape_cast %18 : vector<16xf32> to vector<16x1xf32>
    %cst_9 = arith.constant 1.000000e+00 : f32
    %20 = vector.broadcast %cst_9 : f32 to vector<16x1xf32>
    %21 = arith.addf %19, %20 : vector<16x1xf32>
    %cst_10 = arith.constant 9.99999993E-9 : f32
    %22 = vector.broadcast %cst_10 : f32 to vector<16x1xf32>
    %23 = arith.maximumf %21, %22 : vector<16x1xf32>
    %24 = math.sqrt %23 : vector<16x1xf32>
    %25 = vector.shape_cast %24 : vector<16x1xf32> to vector<16x1xf32>
    %26 = vector.broadcast %25 : vector<16x1xf32> to vector<16x128xf32>
    %27 = arith.select %2, %26, %14 : vector<16x128xi1>, vector<16x128xf32>
    %c0_11 = arith.constant 0 : index
    %c0_12 = arith.constant 0 : index
    %c0_13 = arith.constant 0 : index
    %28 = vector.load %arg4[%c0_11, %c0_12, %c0_13] : memref<3x128x128xbf16, #tpu.memory_space<vmem>>, vector<1x128x128xbf16>
    %29 = vector.shape_cast %28 : vector<1x128x128xbf16> to vector<128x128xbf16>
    %c0_14 = arith.constant 0 : index
    %c0_15 = arith.constant 0 : index
    %c0_16 = arith.constant 0 : index
    %30 = vector.load %arg5[%c0_14, %c0_15, %c0_16] : memref<3x1x128xf32, #tpu.memory_space<vmem>>, vector<1x1x128xf32>
    %31 = vector.shape_cast %30 : vector<1x1x128xf32> to vector<1x128xf32>
    %c0_17 = arith.constant 0 : index
    %c0_18 = arith.constant 0 : index
    %c0_19 = arith.constant 0 : index
    %32 = vector.load %arg6[%c0_17, %c0_18, %c0_19] : memref<3x128x128xbf16, #tpu.memory_space<vmem>>, vector<1x128x128xbf16>
    %33 = vector.shape_cast %32 : vector<1x128x128xbf16> to vector<128x128xbf16>
    %c0_20 = arith.constant 0 : index
    %c0_21 = arith.constant 0 : index
    %c0_22 = arith.constant 0 : index
    %34 = vector.load %arg7[%c0_20, %c0_21, %c0_22] : memref<3x1x128xf32, #tpu.memory_space<vmem>>, vector<1x1x128xf32>
    %35 = vector.shape_cast %34 : vector<1x1x128xf32> to vector<1x128xf32>
    %36 = arith.truncf %27 : vector<16x128xf32> to vector<16x128xbf16>
    %cst_23 = arith.constant dense<0.000000e+00> : vector<16x128xf32>
    %37 = tpu.matmul %36, %29, %cst_23 {dimension_numbers = #tpu.dot_dimension_numbers<[1], [0], [0], [1], [0, 0, 1, 1], [], []>} : vector<16x128xbf16>, vector<128x128xbf16>, vector<16x128xf32> -> vector<16x128xf32>
    %38 = vector.broadcast %31 : vector<1x128xf32> to vector<16x128xf32>
    %39 = arith.addf %37, %38 : vector<16x128xf32>
    %cst_24 = arith.constant 0.000000e+00 : f32
    %40 = vector.broadcast %cst_24 : f32 to vector<16x128xf32>
    %41 = arith.maximumf %39, %40 : vector<16x128xf32>
    %cst_25 = arith.constant 0.000000e+00 : f32
    %42 = vector.broadcast %cst_25 : f32 to vector<16x128xf32>
    %43 = arith.select %2, %42, %41 : vector<16x128xi1>, vector<16x128xf32>
    %44 = arith.mulf %43, %43 : vector<16x128xf32>
    %cst_26 = arith.constant dense<0.000000e+00> : vector<16xf32>
    %45 = vector.multi_reduction <add>, %44, %cst_26 [1] : vector<16x128xf32> to vector<16xf32>
    %46 = vector.shape_cast %45 : vector<16xf32> to vector<16x1xf32>
    %cst_27 = arith.constant 1.000000e+00 : f32
    %47 = vector.broadcast %cst_27 : f32 to vector<16x1xf32>
    %48 = arith.addf %46, %47 : vector<16x1xf32>
    %cst_28 = arith.constant 9.99999993E-9 : f32
    %49 = vector.broadcast %cst_28 : f32 to vector<16x1xf32>
    %50 = arith.maximumf %48, %49 : vector<16x1xf32>
    %51 = math.sqrt %50 : vector<16x1xf32>
    %52 = vector.shape_cast %51 : vector<16x1xf32> to vector<16x1xf32>
    %53 = vector.broadcast %52 : vector<16x1xf32> to vector<16x128xf32>
    %54 = arith.select %2, %53, %41 : vector<16x128xi1>, vector<16x128xf32>
    %55 = arith.truncf %54 : vector<16x128xf32> to vector<16x128xbf16>
    %cst_29 = arith.constant dense<0.000000e+00> : vector<16x128xf32>
    %56 = tpu.matmul %55, %33, %cst_29 {dimension_numbers = #tpu.dot_dimension_numbers<[1], [0], [0], [1], [0, 0, 1, 1], [], []>} : vector<16x128xbf16>, vector<128x128xbf16>, vector<16x128xf32> -> vector<16x128xf32>
    %57 = vector.broadcast %35 : vector<1x128xf32> to vector<16x128xf32>
    %58 = arith.addf %56, %57 : vector<16x128xf32>
    %59 = arith.addf %58, %27 : vector<16x128xf32>
    %cst_30 = arith.constant 0.000000e+00 : f32
    %60 = vector.broadcast %cst_30 : f32 to vector<16x128xf32>
    %61 = arith.maximumf %59, %60 : vector<16x128xf32>
    %cst_31 = arith.constant 0.000000e+00 : f32
    %62 = vector.broadcast %cst_31 : f32 to vector<16x128xf32>
    %63 = arith.select %2, %62, %61 : vector<16x128xi1>, vector<16x128xf32>
    %64 = arith.mulf %63, %63 : vector<16x128xf32>
    %cst_32 = arith.constant dense<0.000000e+00> : vector<16xf32>
    %65 = vector.multi_reduction <add>, %64, %cst_32 [1] : vector<16x128xf32> to vector<16xf32>
    %66 = vector.shape_cast %65 : vector<16xf32> to vector<16x1xf32>
    %cst_33 = arith.constant 1.000000e+00 : f32
    %67 = vector.broadcast %cst_33 : f32 to vector<16x1xf32>
    %68 = arith.addf %66, %67 : vector<16x1xf32>
    %cst_34 = arith.constant 9.99999993E-9 : f32
    %69 = vector.broadcast %cst_34 : f32 to vector<16x1xf32>
    %70 = arith.maximumf %68, %69 : vector<16x1xf32>
    %71 = math.sqrt %70 : vector<16x1xf32>
    %72 = vector.shape_cast %71 : vector<16x1xf32> to vector<16x1xf32>
    %73 = vector.broadcast %72 : vector<16x1xf32> to vector<16x128xf32>
    %74 = arith.select %2, %73, %61 : vector<16x128xi1>, vector<16x128xf32>
    %c1 = arith.constant 1 : index
    %c0_35 = arith.constant 0 : index
    %c0_36 = arith.constant 0 : index
    %75 = vector.load %arg4[%c1, %c0_35, %c0_36] : memref<3x128x128xbf16, #tpu.memory_space<vmem>>, vector<1x128x128xbf16>
    %76 = vector.shape_cast %75 : vector<1x128x128xbf16> to vector<128x128xbf16>
    %c1_37 = arith.constant 1 : index
    %c0_38 = arith.constant 0 : index
    %c0_39 = arith.constant 0 : index
    %77 = vector.load %arg5[%c1_37, %c0_38, %c0_39] : memref<3x1x128xf32, #tpu.memory_space<vmem>>, vector<1x1x128xf32>
    %78 = vector.shape_cast %77 : vector<1x1x128xf32> to vector<1x128xf32>
    %c1_40 = arith.constant 1 : index
    %c0_41 = arith.constant 0 : index
    %c0_42 = arith.constant 0 : index
    %79 = vector.load %arg6[%c1_40, %c0_41, %c0_42] : memref<3x128x128xbf16, #tpu.memory_space<vmem>>, vector<1x128x128xbf16>
    %80 = vector.shape_cast %79 : vector<1x128x128xbf16> to vector<128x128xbf16>
    %c1_43 = arith.constant 1 : index
    %c0_44 = arith.constant 0 : index
    %c0_45 = arith.constant 0 : index
    %81 = vector.load %arg7[%c1_43, %c0_44, %c0_45] : memref<3x1x128xf32, #tpu.memory_space<vmem>>, vector<1x1x128xf32>
    %82 = vector.shape_cast %81 : vector<1x1x128xf32> to vector<1x128xf32>
    %83 = arith.truncf %74 : vector<16x128xf32> to vector<16x128xbf16>
    %cst_46 = arith.constant dense<0.000000e+00> : vector<16x128xf32>
    %84 = tpu.matmul %83, %76, %cst_46 {dimension_numbers = #tpu.dot_dimension_numbers<[1], [0], [0], [1], [0, 0, 1, 1], [], []>} : vector<16x128xbf16>, vector<128x128xbf16>, vector<16x128xf32> -> vector<16x128xf32>
    %85 = vector.broadcast %78 : vector<1x128xf32> to vector<16x128xf32>
    %86 = arith.addf %84, %85 : vector<16x128xf32>
    %cst_47 = arith.constant 0.000000e+00 : f32
    %87 = vector.broadcast %cst_47 : f32 to vector<16x128xf32>
    %88 = arith.maximumf %86, %87 : vector<16x128xf32>
    %cst_48 = arith.constant 0.000000e+00 : f32
    %89 = vector.broadcast %cst_48 : f32 to vector<16x128xf32>
    %90 = arith.select %2, %89, %88 : vector<16x128xi1>, vector<16x128xf32>
    %91 = arith.mulf %90, %90 : vector<16x128xf32>
    %cst_49 = arith.constant dense<0.000000e+00> : vector<16xf32>
    %92 = vector.multi_reduction <add>, %91, %cst_49 [1] : vector<16x128xf32> to vector<16xf32>
    %93 = vector.shape_cast %92 : vector<16xf32> to vector<16x1xf32>
    %cst_50 = arith.constant 1.000000e+00 : f32
    %94 = vector.broadcast %cst_50 : f32 to vector<16x1xf32>
    %95 = arith.addf %93, %94 : vector<16x1xf32>
    %cst_51 = arith.constant 9.99999993E-9 : f32
    %96 = vector.broadcast %cst_51 : f32 to vector<16x1xf32>
    %97 = arith.maximumf %95, %96 : vector<16x1xf32>
    %98 = math.sqrt %97 : vector<16x1xf32>
    %99 = vector.shape_cast %98 : vector<16x1xf32> to vector<16x1xf32>
    %100 = vector.broadcast %99 : vector<16x1xf32> to vector<16x128xf32>
    %101 = arith.select %2, %100, %88 : vector<16x128xi1>, vector<16x128xf32>
    %102 = arith.truncf %101 : vector<16x128xf32> to vector<16x128xbf16>
    %cst_52 = arith.constant dense<0.000000e+00> : vector<16x128xf32>
    %103 = tpu.matmul %102, %80, %cst_52 {dimension_numbers = #tpu.dot_dimension_numbers<[1], [0], [0], [1], [0, 0, 1, 1], [], []>} : vector<16x128xbf16>, vector<128x128xbf16>, vector<16x128xf32> -> vector<16x128xf32>
    %104 = vector.broadcast %82 : vector<1x128xf32> to vector<16x128xf32>
    %105 = arith.addf %103, %104 : vector<16x128xf32>
    %106 = arith.addf %105, %74 : vector<16x128xf32>
    %cst_53 = arith.constant 0.000000e+00 : f32
    %107 = vector.broadcast %cst_53 : f32 to vector<16x128xf32>
    %108 = arith.maximumf %106, %107 : vector<16x128xf32>
    %cst_54 = arith.constant 0.000000e+00 : f32
    %109 = vector.broadcast %cst_54 : f32 to vector<16x128xf32>
    %110 = arith.select %2, %109, %108 : vector<16x128xi1>, vector<16x128xf32>
    %111 = arith.mulf %110, %110 : vector<16x128xf32>
    %cst_55 = arith.constant dense<0.000000e+00> : vector<16xf32>
    %112 = vector.multi_reduction <add>, %111, %cst_55 [1] : vector<16x128xf32> to vector<16xf32>
    %113 = vector.shape_cast %112 : vector<16xf32> to vector<16x1xf32>
    %cst_56 = arith.constant 1.000000e+00 : f32
    %114 = vector.broadcast %cst_56 : f32 to vector<16x1xf32>
    %115 = arith.addf %113, %114 : vector<16x1xf32>
    %cst_57 = arith.constant 9.99999993E-9 : f32
    %116 = vector.broadcast %cst_57 : f32 to vector<16x1xf32>
    %117 = arith.maximumf %115, %116 : vector<16x1xf32>
    %118 = math.sqrt %117 : vector<16x1xf32>
    %119 = vector.shape_cast %118 : vector<16x1xf32> to vector<16x1xf32>
    %120 = vector.broadcast %119 : vector<16x1xf32> to vector<16x128xf32>
    %121 = arith.select %2, %120, %108 : vector<16x128xi1>, vector<16x128xf32>
    %c2 = arith.constant 2 : index
    %c0_58 = arith.constant 0 : index
    %c0_59 = arith.constant 0 : index
    %122 = vector.load %arg4[%c2, %c0_58, %c0_59] : memref<3x128x128xbf16, #tpu.memory_space<vmem>>, vector<1x128x128xbf16>
    %123 = vector.shape_cast %122 : vector<1x128x128xbf16> to vector<128x128xbf16>
    %c2_60 = arith.constant 2 : index
    %c0_61 = arith.constant 0 : index
    %c0_62 = arith.constant 0 : index
    %124 = vector.load %arg5[%c2_60, %c0_61, %c0_62] : memref<3x1x128xf32, #tpu.memory_space<vmem>>, vector<1x1x128xf32>
    %125 = vector.shape_cast %124 : vector<1x1x128xf32> to vector<1x128xf32>
    %c2_63 = arith.constant 2 : index
    %c0_64 = arith.constant 0 : index
    %c0_65 = arith.constant 0 : index
    %126 = vector.load %arg6[%c2_63, %c0_64, %c0_65] : memref<3x128x128xbf16, #tpu.memory_space<vmem>>, vector<1x128x128xbf16>
    %127 = vector.shape_cast %126 : vector<1x128x128xbf16> to vector<128x128xbf16>
    %c2_66 = arith.constant 2 : index
    %c0_67 = arith.constant 0 : index
    %c0_68 = arith.constant 0 : index
    %128 = vector.load %arg7[%c2_66, %c0_67, %c0_68] : memref<3x1x128xf32, #tpu.memory_space<vmem>>, vector<1x1x128xf32>
    %129 = vector.shape_cast %128 : vector<1x1x128xf32> to vector<1x128xf32>
    %130 = arith.truncf %121 : vector<16x128xf32> to vector<16x128xbf16>
    %cst_69 = arith.constant dense<0.000000e+00> : vector<16x128xf32>
    %131 = tpu.matmul %130, %123, %cst_69 {dimension_numbers = #tpu.dot_dimension_numbers<[1], [0], [0], [1], [0, 0, 1, 1], [], []>} : vector<16x128xbf16>, vector<128x128xbf16>, vector<16x128xf32> -> vector<16x128xf32>
    %132 = vector.broadcast %125 : vector<1x128xf32> to vector<16x128xf32>
    %133 = arith.addf %131, %132 : vector<16x128xf32>
    %cst_70 = arith.constant 0.000000e+00 : f32
    %134 = vector.broadcast %cst_70 : f32 to vector<16x128xf32>
    %135 = arith.maximumf %133, %134 : vector<16x128xf32>
    %cst_71 = arith.constant 0.000000e+00 : f32
    %136 = vector.broadcast %cst_71 : f32 to vector<16x128xf32>
    %137 = arith.select %2, %136, %135 : vector<16x128xi1>, vector<16x128xf32>
    %138 = arith.mulf %137, %137 : vector<16x128xf32>
    %cst_72 = arith.constant dense<0.000000e+00> : vector<16xf32>
    %139 = vector.multi_reduction <add>, %138, %cst_72 [1] : vector<16x128xf32> to vector<16xf32>
    %140 = vector.shape_cast %139 : vector<16xf32> to vector<16x1xf32>
    %cst_73 = arith.constant 1.000000e+00 : f32
    %141 = vector.broadcast %cst_73 : f32 to vector<16x1xf32>
    %142 = arith.addf %140, %141 : vector<16x1xf32>
    %cst_74 = arith.constant 9.99999993E-9 : f32
    %143 = vector.broadcast %cst_74 : f32 to vector<16x1xf32>
    %144 = arith.maximumf %142, %143 : vector<16x1xf32>
    %145 = math.sqrt %144 : vector<16x1xf32>
    %146 = vector.shape_cast %145 : vector<16x1xf32> to vector<16x1xf32>
    %147 = vector.broadcast %146 : vector<16x1xf32> to vector<16x128xf32>
    %148 = arith.select %2, %147, %135 : vector<16x128xi1>, vector<16x128xf32>
    %149 = arith.truncf %148 : vector<16x128xf32> to vector<16x128xbf16>
    %cst_75 = arith.constant dense<0.000000e+00> : vector<16x128xf32>
    %150 = tpu.matmul %149, %127, %cst_75 {dimension_numbers = #tpu.dot_dimension_numbers<[1], [0], [0], [1], [0, 0, 1, 1], [], []>} : vector<16x128xbf16>, vector<128x128xbf16>, vector<16x128xf32> -> vector<16x128xf32>
    %151 = vector.broadcast %129 : vector<1x128xf32> to vector<16x128xf32>
    %152 = arith.addf %150, %151 : vector<16x128xf32>
    %153 = arith.addf %152, %121 : vector<16x128xf32>
    %cst_76 = arith.constant 0.000000e+00 : f32
    %154 = vector.broadcast %cst_76 : f32 to vector<16x128xf32>
    %155 = arith.maximumf %153, %154 : vector<16x128xf32>
    %cst_77 = arith.constant 0.000000e+00 : f32
    %156 = vector.broadcast %cst_77 : f32 to vector<16x128xf32>
    %157 = arith.select %2, %156, %155 : vector<16x128xi1>, vector<16x128xf32>
    %158 = arith.mulf %157, %157 : vector<16x128xf32>
    %cst_78 = arith.constant dense<0.000000e+00> : vector<16xf32>
    %159 = vector.multi_reduction <add>, %158, %cst_78 [1] : vector<16x128xf32> to vector<16xf32>
    %160 = vector.shape_cast %159 : vector<16xf32> to vector<16x1xf32>
    %cst_79 = arith.constant 1.000000e+00 : f32
    %161 = vector.broadcast %cst_79 : f32 to vector<16x1xf32>
    %162 = arith.addf %160, %161 : vector<16x1xf32>
    %cst_80 = arith.constant 9.99999993E-9 : f32
    %163 = vector.broadcast %cst_80 : f32 to vector<16x1xf32>
    %164 = arith.maximumf %162, %163 : vector<16x1xf32>
    %165 = math.sqrt %164 : vector<16x1xf32>
    %166 = vector.shape_cast %165 : vector<16x1xf32> to vector<16x1xf32>
    %167 = vector.broadcast %166 : vector<16x1xf32> to vector<16x128xf32>
    %168 = arith.select %2, %167, %155 : vector<16x128xi1>, vector<16x128xf32>
    %c0_81 = arith.constant 0 : index
    %c0_82 = arith.constant 0 : index
    %169 = vector.load %arg8[%c0_81, %c0_82] : memref<128x128xbf16, #tpu.memory_space<vmem>>, vector<128x128xbf16>
    %c0_83 = arith.constant 0 : index
    %c0_84 = arith.constant 0 : index
    %170 = vector.load %arg9[%c0_83, %c0_84] : memref<1x128xf32, #tpu.memory_space<vmem>>, vector<1x128xf32>
    %171 = arith.truncf %168 : vector<16x128xf32> to vector<16x128xbf16>
    %cst_85 = arith.constant dense<0.000000e+00> : vector<16x128xf32>
    %172 = tpu.matmul %171, %169, %cst_85 {dimension_numbers = #tpu.dot_dimension_numbers<[1], [0], [0], [1], [0, 0, 1, 1], [], []>} : vector<16x128xbf16>, vector<128x128xbf16>, vector<16x128xf32> -> vector<16x128xf32>
    %173 = vector.broadcast %170 : vector<1x128xf32> to vector<16x128xf32>
    %174 = arith.addf %172, %173 : vector<16x128xf32>
    %cst_86 = arith.constant 0.000000e+00 : f32
    %175 = vector.broadcast %cst_86 : f32 to vector<16x128xf32>
    %176 = arith.select %5, %175, %174 : vector<16x128xi1>, vector<16x128xf32>
    %177 = arith.mulf %176, %176 : vector<16x128xf32>
    %cst_87 = arith.constant dense<0.000000e+00> : vector<16xf32>
    %178 = vector.multi_reduction <add>, %177, %cst_87 [1] : vector<16x128xf32> to vector<16xf32>
    %179 = vector.shape_cast %178 : vector<16xf32> to vector<16x1xf32>
    %cst_88 = arith.constant 1.000000e+00 : f32
    %180 = vector.broadcast %cst_88 : f32 to vector<16x1xf32>
    %181 = arith.addf %179, %180 : vector<16x1xf32>
    %cst_89 = arith.constant 9.99999993E-9 : f32
    %182 = vector.broadcast %cst_89 : f32 to vector<16x1xf32>
    %183 = arith.maximumf %181, %182 : vector<16x1xf32>
    %184 = math.sqrt %183 : vector<16x1xf32>
    %185 = vector.shape_cast %184 : vector<16x1xf32> to vector<16x1xf32>
    %186 = vector.broadcast %185 : vector<16x1xf32> to vector<16x128xf32>
    %187 = arith.select %5, %186, %174 : vector<16x128xi1>, vector<16x128xf32>
    %c0_90 = arith.constant 0 : index
    %c0_91 = arith.constant 0 : index
    %188 = vector.load %arg10[%c0_90, %c0_91] : memref<16x128xf32, #tpu.memory_space<vmem>>, vector<16x128xf32>
    tpu.vector_store %arg10[%c0_90, %c0_91], %187 {strides = array<i32>} : memref<16x128xf32, #tpu.memory_space<vmem>>, vector<16x128xf32>,
    return
  }
  func.func @transform_0(%arg0: i32) -> (i32, i32) {
    %c0_i32 = arith.constant 0 : i32
    %c0_i32_0 = arith.constant 0 : i32
    return %arg0, %c0_i32 : i32, i32
  }
  func.func @transform_1(%arg0: i32) -> (i32, i32) {
    %c0_i32 = arith.constant 0 : i32
    %c0_i32_0 = arith.constant 0 : i32
    %c0_i32_1 = arith.constant 0 : i32
    return %c0_i32, %c0_i32_0 : i32, i32
  }
  func.func @transform_2(%arg0: i32) -> (i32, i32) {
    %c0_i32 = arith.constant 0 : i32
    %c0_i32_0 = arith.constant 0 : i32
    %c0_i32_1 = arith.constant 0 : i32
    return %c0_i32, %c0_i32_0 : i32, i32
  }
  func.func @transform_3(%arg0: i32) -> (i32, i32, i32) {
    %c0_i32 = arith.constant 0 : i32
    %c0_i32_0 = arith.constant 0 : i32
    %c0_i32_1 = arith.constant 0 : i32
    %c0_i32_2 = arith.constant 0 : i32
    return %c0_i32, %c0_i32_0, %c0_i32_1 : i32, i32, i32
  }
  func.func @transform_4(%arg0: i32) -> (i32, i32, i32) {
    %c0_i32 = arith.constant 0 : i32
    %c0_i32_0 = arith.constant 0 : i32
    %c0_i32_1 = arith.constant 0 : i32
    %c0_i32_2 = arith.constant 0 : i32
    return %c0_i32, %c0_i32_0, %c0_i32_1 : i32, i32, i32
  }
  func.func @transform_5(%arg0: i32) -> (i32, i32, i32) {
    %c0_i32 = arith.constant 0 : i32
    %c0_i32_0 = arith.constant 0 : i32
    %c0_i32_1 = arith.constant 0 : i32
    %c0_i32_2 = arith.constant 0 : i32
    return %c0_i32, %c0_i32_0, %c0_i32_1 : i32, i32, i32
  }
  func.func @transform_6(%arg0: i32) -> (i32, i32, i32) {
    %c0_i32 = arith.constant 0 : i32
    %c0_i32_0 = arith.constant 0 : i32
    %c0_i32_1 = arith.constant 0 : i32
    %c0_i32_2 = arith.constant 0 : i32
    return %c0_i32, %c0_i32_0, %c0_i32_1 : i32, i32, i32
  }
  func.func @transform_7(%arg0: i32) -> (i32, i32) {
    %c0_i32 = arith.constant 0 : i32
    %c0_i32_0 = arith.constant 0 : i32
    %c0_i32_1 = arith.constant 0 : i32
    return %c0_i32, %c0_i32_0 : i32, i32
  }
  func.func @transform_8(%arg0: i32) -> (i32, i32) {
    %c0_i32 = arith.constant 0 : i32
    %c0_i32_0 = arith.constant 0 : i32
    %c0_i32_1 = arith.constant 0 : i32
    return %c0_i32, %c0_i32_0 : i32, i32
  }
  func.func @transform_9(%arg0: i32) -> (i32, i32) {
    %c0_i32 = arith.constant 0 : i32
    %c0_i32_0 = arith.constant 0 : i32
    return %arg0, %c0_i32 : i32, i32
  }
}

</mosaic_0001>

<bundles_post_ra>
// kernel: fully_connected_resnet.1
= control target key start
LH: loop header
LB: loop body
LE: loop exit
PB: predicated region body
PF: predicated region fallthrough
CT: control target
= control target key end

     0   :  { %v1670_v0 = vmov 0.0   ;;  %vm1671_vm0 = vmmov 0   ;;  %v33_v14 = vlaneseq  ;;  %s2121_s1 = inlined_call_operand.vmem [shape: bf16[128,128], index: 1, kind: input, shape index: {}]   ;;  %s2122_s0 = inlined_call_operand.vmem [shape: f32[16,128], index: 0, kind: input, shape index: {}]   ;;  %s2123_s3 = inlined_call_operand.vmem [shape: bf16[3,128,128], index: 3, kind: input, shape index: {}]   ;;  %s2124_s2 = inlined_call_operand.vmem [shape: f32[1,128], index: 2, kind: input, shape index: {}]   ;;  %s2125_s5 = inlined_call_operand.vmem [shape: bf16[3,128,128], index: 5, kind: input, shape index: {}]   ;;  %s2126_s4 = inlined_call_operand.vmem [shape: f32[3,1,128], index: 4, kind: input, shape index: {}]   ;;  %s2127_s6 = inlined_call_operand.vmem [shape: f32[3,1,128], index: 6, kind: input, shape index: {}]   ;;  %s2128_s7 = inlined_call_operand.vmem [shape: bf16[128,128], index: 7, kind: input, shape index: {}]   ;;  %s2129_s8 = inlined_call_operand.vmem [shape: f32[1,128], index: 8, kind: input, shape index: {}]   ;;  %s2130_s9 = inlined_call_operand.vmem [shape: f32[16,128], index: 9, kind: output, shape index: {}]  }
   0x1   :  { %1412 = vmatprep.subr.bf16.mxu0 %v1670_v0  ;;  %v1574_v1 = vld [vmem:[%s2121_s1] sm:$0xff]   ;;  %1428 = vmatprep.mubr.msk.bf16.mxu0 %vm1671_vm0, %v1670_v0  ;;  %v1575_v2 = vld [vmem:[%s2121_s1 + $0x8] sm:$0xff]   ;;  %v1576_v3 = vld [vmem:[%s2121_s1 + $0x10] sm:$0xff]  }
   0x2   :  { %1432 = vmatprep.subr.bf16.mxu1 %v1670_v0  ;;  %1448 = vmatprep.mubr.msk.bf16.mxu1 %vm1671_vm0, %v1670_v0  ;;  %v1577_v4 = vld [vmem:[%s2121_s1 + $0x18] sm:$0xff]   ;;  %v1578_v5 = vld [vmem:[%s2121_s1 + $0x20] sm:$0xff]   ;;  %v1579_v6 = vld [vmem:[%s2121_s1 + $0x28] sm:$0xff]   ;;  %v1779_v16 = vand.u32 127, %v33_v14 }
   0x3   :  { %1413 = vmatpush3.bf16.msra.mxu0 %v1574_v1  ;;  %v1580_v7 = vld [vmem:[%s2121_s1 + $0x30] sm:$0xff]   ;;  %v1581_v8 = vld [vmem:[%s2121_s1 + $0x38] sm:$0xff]   ;;  %v36_v9 = vld [vmem:[%s2122_s0] sm:$0xff] }
   0x4   :  { %1414 = vmatprep.subr.bf16.mxu0 %v1670_v0  ;;  %v37_v10 = vld [vmem:[%s2122_s0 + $0x8] sm:$0xff]  ;;  %v1582_v12 = vld [vmem:[%s2123_s3] sm:$0xff]   ;;  %vm35_vm1 = vcmp.eq.s32.totalorder %v1779_v16, 0  ;;  %v1584_v29 = vld [vmem:[%s2123_s3 + $0x10] sm:$0xff]  }
   0x5   :  { %v55_v11 = vpack.c.bf16 %v37_v10, %v36_v9  ;;  %v1583_v13 = vld [vmem:[%s2123_s3 + $0x8] sm:$0xff]   ;;  %1433 = vmatpush3.bf16.msra.mxu1 %v1582_v12  ;;  %v1200_v15 = vld [vmem:[%s2124_s2] ss:$0 sm:$0xff]  ;;  %v1585_v30 = vld [vmem:[%s2123_s3 + $0x18] sm:$0xff]  }
   0x6   :  { %1434 = vmatprep.subr.bf16.mxu1 %v1670_v0  ;;  %v1586_v31 = vld [vmem:[%s2123_s3 + $0x20] sm:$0xff]   ;;  %v1587_v32 = vld [vmem:[%s2123_s3 + $0x28] sm:$0xff]   ;;  %v1588_v33 = vld [vmem:[%s2123_s3 + $0x30] sm:$0xff]  }
   0x7   :  { %1415 = vmatpush3.bf16.msra.mxu0 %v1575_v2  ;;  %v1589_v34 = vld [vmem:[%s2123_s3 + $0x38] sm:$0xff]   ;;  %v1590_v54 = vld [vmem:[%s2125_s5] sm:$0xff]   ;;  %v1591_v55 = vld [vmem:[%s2125_s5 + $0x8] sm:$0xff]  }
   0x8   :  { %1416 = vmatprep.subr.bf16.mxu0 %v1670_v0  ;;  %v1209_v56 = vld [vmem:[%s2126_s4] ss:$0 sm:$0xff]  ;;  %v1595_v9 = vld [vmem:[%s2125_s5 + $0x28] sm:$0xff]   ;;  %v1596_v10 = vld [vmem:[%s2125_s5 + $0x30] sm:$0xff]  }
   0x9   :  { %1435 = vmatpush3.bf16.msra.mxu1 %v1583_v13 }
   0xa   :  { %1436 = vmatprep.subr.bf16.mxu1 %v1670_v0 }
   0xb   :  { %1417 = vmatpush3.bf16.msra.mxu0 %v1576_v3 }
   0xc   :  { %1418 = vmatprep.subr.bf16.mxu0 %v1670_v0 }
   0xd   :  { %1437 = vmatpush3.bf16.msra.mxu1 %v1584_v29 }
   0xe   :  { %1438 = vmatprep.subr.bf16.mxu1 %v1670_v0 }
   0xf   :  { %1419 = vmatpush3.bf16.msra.mxu0 %v1577_v4 }
  0x10   :  { %1420 = vmatprep.subr.bf16.mxu0 %v1670_v0 }
  0x11   :  { %1439 = vmatpush3.bf16.msra.mxu1 %v1585_v30 }
  0x12   :  { %1440 = vmatprep.subr.bf16.mxu1 %v1670_v0 }
  0x13   :  { %1421 = vmatpush3.bf16.msra.mxu0 %v1578_v5 }
  0x14   :  { %1422 = vmatprep.subr.bf16.mxu0 %v1670_v0 }
  0x15   :  { %1441 = vmatpush3.bf16.msra.mxu1 %v1586_v31 }
  0x16   :  { %1442 = vmatprep.subr.bf16.mxu1 %v1670_v0 }
  0x17   :  { %1423 = vmatpush3.bf16.msra.mxu0 %v1579_v6  ;;  %v1592_v6 = vld [vmem:[%s2125_s5 + $0x10] sm:$0xff]  }
  0x18   :  { %1424 = vmatprep.subr.bf16.mxu0 %v1670_v0 }
  0x19   :  { %1443 = vmatpush3.bf16.msra.mxu1 %v1587_v32  ;;  %v1598_v32 = vld [vmem:[%s2123_s3 + $0x40] sm:$0xff]  }
  0x1a   :  { %1444 = vmatprep.subr.bf16.mxu1 %v1670_v0 }
  0x1b   :  { %1425 = vmatpush3.bf16.msra.mxu0 %v1580_v7  ;;  %v1593_v7 = vld [vmem:[%s2125_s5 + $0x18] sm:$0xff]  }
  0x1c   :  { %1426 = vmatprep.subr.bf16.mxu0 %v1670_v0 }
  0x1d   :  { %1445 = vmatpush3.bf16.msra.mxu1 %v1588_v33  ;;  %v1599_v33 = vld [vmem:[%s2123_s3 + $0x48] sm:$0xff]  }
  0x1e   :  { %1446 = vmatprep.subr.bf16.mxu1 %v1670_v0 }
  0x1f   :  { %1427 = vmatpush3.bf16.msra.mxu0 %v1581_v8  ;;  %v1594_v8 = vld [vmem:[%s2125_s5 + $0x20] sm:$0xff]  }
  0x20   :  { %1452 = vmatprep.subr.bf16.mxu0 %v1670_v0 }
  0x21   :  { %1447 = vmatpush3.bf16.msra.mxu1 %v1589_v34  ;;  %v1218_v34 = vld [vmem:[%s2127_s6] ss:$0 sm:$0xff] }
  0x22   :  { %1429 = vmatmul.mubr.bf16.vlgmr.msra.gmra.mrb[0].mxu0 %v55_v11  ;;  %1472 = vmatprep.subr.bf16.mxu1 %v1670_v0  ;;  %v1597_v11 = vld [vmem:[%s2125_s5 + $0x38] sm:$0xff]  }
  0x23   :  { %1468 = vmatprep.mubr.msk.bf16.mxu0 %vm1671_vm0, %v1670_v0  ;;  %1453 = vmatpush3.bf16.msra.mxu0 %v1590_v54  ;;  %v1605_v54 = vld [vmem:[%s2123_s3 + $0x78] sm:$0xff]  }
  0x24   :  { %1454 = vmatprep.subr.bf16.mxu0 %v1670_v0 }
  0x27   :  { %1455 = vmatpush3.bf16.msra.mxu0 %v1591_v55 }
  0x28   :  { %1456 = vmatprep.subr.bf16.mxu0 %v1670_v0 }
  0x2b   :  { %1457 = vmatpush3.bf16.msra.mxu0 %v1592_v6 }
  0x2c   :  { %1458 = vmatprep.subr.bf16.mxu0 %v1670_v0 }
  0x2f   :  { %1459 = vmatpush3.bf16.msra.mxu0 %v1593_v7 }
  0x30   :  { %1460 = vmatprep.subr.bf16.mxu0 %v1670_v0 }
  0x33   :  { %1461 = vmatpush3.bf16.msra.mxu0 %v1594_v8 }
  0x34   :  { %1462 = vmatprep.subr.bf16.mxu0 %v1670_v0 }
  0x37   :  { %1463 = vmatpush3.bf16.msra.mxu0 %v1595_v9 }
  0x38   :  { %1464 = vmatprep.subr.bf16.mxu0 %v1670_v0 }
  0x3b   :  { %1465 = vmatpush3.bf16.msra.mxu0 %v1596_v10 }
  0x3c   :  { %1466 = vmatprep.subr.bf16.mxu0 %v1670_v0 }
  0x3f   :  { %1467 = vmatpush3.bf16.msra.mxu0 %v1597_v11  ;;  %v1606_v11 = vld [vmem:[%s2125_s5 + $0x40] sm:$0xff]  }
  0x40   :  { %1492 = vmatprep.subr.bf16.mxu0 %v1670_v0 }
  0xf5   :  { %v144_v17 = vpop.f32.mrb[0].mxu0 }
  0xf6   :  { %v145_v18 = vadd.f32 %v1200_v15, %v144_v17  ;;  %v1430_v19 = vpop.f32.mrb[1].mxu0 }
  0xf7   :  { %v147_v20 = vpop.f32.mrb[2].mxu0 }
  0xf8   :  { %v151_v21 = vmax.f32 %v145_v18, 0.0  ;;  %v148_v22 = vadd.f32 %v1200_v15, %v147_v20  ;;  %v1431_v23 = vpop.f32.mrb[3].mxu0 }
  0xfa   :  { %v152_v24 = vmax.f32 %v148_v22, 0.0  ;;  %v153_v25 = vsel %vm35_vm1, 0.0, %v151_v21 }
  0xfb   :  { %v155_v26 = vmul.f32 %v153_v25, %v153_v25 }
  0xfc   :  { %v154_v27 = vsel %vm35_vm1, 0.0, %v152_v24 }
  0xfd   :  { %157 = vadd.xlane.f32.xlu0 %v155_v26  ;;  %v156_v28 = vmul.f32 %v154_v27, %v154_v27 }
 0x101   :  { %159 = vadd.xlane.f32.xlu0 %v156_v28 }
 0x18a   :  { %v158_v35 = vpop.xlane.xlu0 %157 }
 0x18b   :  { %v161_v36 = vadd.f32 1.0, %v158_v35 }
 0x18d   :  { %v163_v37 = vmax.f32 %v161_v36, 1e-08 }
 0x18e   :  { %v160_v38 = vpop.xlane.xlu0 %159 }
 0x18f   :  { %1638 = vrsqrt.f32 %v163_v37  ;;  %v162_v39 = vadd.f32 1.0, %v160_v38  ;;  %vm167_vm2 = vcmp.eq.f32.partialorder %v163_v37, inf  ;;  %v170_v45 = vand.u32 2147483648, %v163_v37 }
 0x190   :  { %vm169_vm3 = vcmp.eq.f32.partialorder %v163_v37, 0.0 }
 0x191   :  { %v164_v40 = vmax.f32 %v162_v39, 1e-08 }
 0x193   :  { %1640 = vrsqrt.f32 %v164_v40  ;;  %vm174_vm4 = vcmp.eq.f32.partialorder %v164_v40, inf  ;;  %v177_v48 = vand.u32 2147483648, %v164_v40  ;;  %vm176_vm5 = vcmp.eq.f32.partialorder %v164_v40, 0.0 }
 0x199   :  { %v1639_v41 = vpop.eup %1638 }
 0x19a   :  { %v166_v42 = vmul.f32 %v1639_v41, %v163_v37 }
 0x19c   :  { %v168_v43 = vsel %vm167_vm2, %v163_v37, %v166_v42 }
 0x19d   :  { %v1641_v44 = vpop.eup %1640  ;;  %v171_v47 = vsel %vm169_vm3, %v170_v45, %v168_v43 }
 0x19e   :  { %v173_v46 = vmul.f32 %v1641_v44, %v164_v40  ;;  %v1812_v51 = vsel %vm35_vm1, %v171_v47, %v151_v21 }
 0x1a0   :  { %v175_v49 = vsel %vm174_vm4, %v164_v40, %v173_v46 }
 0x1a1   :  { %v178_v50 = vsel %vm176_vm5, %v177_v48, %v175_v49  ;;  %v1600_v49 = vld [vmem:[%s2123_s3 + $0x50] sm:$0xff]  }
 0x1a2   :  { %v1816_v52 = vsel %vm35_vm1, %v178_v50, %v152_v24  ;;  %v1601_v50 = vld [vmem:[%s2123_s3 + $0x58] sm:$0xff]  }
 0x1a3   :  { %v215_v53 = vpack.c.bf16 %v1816_v52, %v1812_v51 }
 0x1a5   :  { %1449 = vmatmul.mubr.bf16.vlgmr.msra.gmra.mrb[0].mxu1 %v215_v53  ;;  %v1604_v53 = vld [vmem:[%s2123_s3 + $0x70] sm:$0xff]  }
 0x1a6   :  { %1488 = vmatprep.mubr.msk.bf16.mxu1 %vm1671_vm0, %v1670_v0  ;;  %1473 = vmatpush3.bf16.msra.mxu1 %v1598_v32  ;;  %v1613_v32 = vld [vmem:[%s2125_s5 + $0x78] sm:$0xff]  }
 0x1a7   :  { %1474 = vmatprep.subr.bf16.mxu1 %v1670_v0 }
 0x1aa   :  { %1475 = vmatpush3.bf16.msra.mxu1 %v1599_v33 }
 0x1ab   :  { %1476 = vmatprep.subr.bf16.mxu1 %v1670_v0 }
 0x1ae   :  { %1477 = vmatpush3.bf16.msra.mxu1 %v1600_v49 }
 0x1af   :  { %1478 = vmatprep.subr.bf16.mxu1 %v1670_v0 }
 0x1b2   :  { %1479 = vmatpush3.bf16.msra.mxu1 %v1601_v50 }
 0x1b3   :  { %1480 = vmatprep.subr.bf16.mxu1 %v1670_v0 }
 0x278   :  { %v304_v57 = vpop.f32.mrb[0].mxu1 }
 0x279   :  { %v305_v58 = vadd.f32 %v1209_v56, %v304_v57  ;;  %v1450_v59 = vpop.f32.mrb[1].mxu1 }
 0x27a   :  { %v307_v60 = vpop.f32.mrb[2].mxu1 }
 0x27b   :  { %v311_v61 = vmax.f32 %v305_v58, 0.0  ;;  %v308_v62 = vadd.f32 %v1209_v56, %v307_v60  ;;  %v1451_v63 = vpop.f32.mrb[3].mxu1 }
 0x27d   :  { %v312_v1 = vmax.f32 %v308_v62, 0.0  ;;  %v313_v2 = vsel %vm35_vm1, 0.0, %v311_v61 }
 0x27e   :  { %v315_v3 = vmul.f32 %v313_v2, %v313_v2 }
 0x27f   :  { %v314_v4 = vsel %vm35_vm1, 0.0, %v312_v1 }
 0x280   :  { %317 = vadd.xlane.f32.xlu1 %v315_v3  ;;  %v316_v5 = vmul.f32 %v314_v4, %v314_v4 }
 0x284   :  { %319 = vadd.xlane.f32.xlu1 %v316_v5 }
 0x30d   :  { %v318_v12 = vpop.xlane.xlu1 %317 }
 0x30e   :  { %v321_v13 = vadd.f32 1.0, %v318_v12  ;;  %v1607_v12 = vld [vmem:[%s2125_s5 + $0x48] sm:$0xff]  }
 0x310   :  { %v323_v14 = vmax.f32 %v321_v13, 1e-08  ;;  %v1261_v13 = vld [vmem:[%s2126_s4 + $0x1] ss:$0 sm:$0xff] }
 0x311   :  { %v320_v15 = vpop.xlane.xlu1 %319 }
 0x312   :  { %1642 = vrsqrt.f32 %v323_v14  ;;  %v322_v17 = vadd.f32 1.0, %v320_v15  ;;  %vm327_vm6 = vcmp.eq.f32.partialorder %v323_v14, inf  ;;  %v330_v23 = vand.u32 2147483648, %v323_v14 }
 0x313   :  { %vm329_vm7 = vcmp.eq.f32.partialorder %v323_v14, 0.0 }
 0x314   :  { %v324_v18 = vmax.f32 %v322_v17, 1e-08 }
 0x316   :  { %1644 = vrsqrt.f32 %v324_v18  ;;  %vm334_vm8 = vcmp.eq.f32.partialorder %v324_v18, inf  ;;  %v337_v26 = vand.u32 2147483648, %v324_v18  ;;  %vm336_vm9 = vcmp.eq.f32.partialorder %v324_v18, 0.0 }
 0x31c   :  { %v1643_v19 = vpop.eup %1642 }
 0x31d   :  { %v326_v20 = vmul.f32 %v1643_v19, %v323_v14 }
 0x31f   :  { %v328_v21 = vsel %vm327_vm6, %v323_v14, %v326_v20 }
 0x320   :  { %v1645_v22 = vpop.eup %1644  ;;  %v331_v25 = vsel %vm329_vm7, %v330_v23, %v328_v21 }
 0x321   :  { %v333_v24 = vmul.f32 %v1645_v22, %v324_v18  ;;  %v339_v29 = vsel %vm35_vm1, %v331_v25, %v311_v61 }
 0x323   :  { %v335_v27 = vsel %vm334_vm8, %v324_v18, %v333_v24 }
 0x324   :  { %v338_v28 = vsel %vm336_vm9, %v337_v26, %v335_v27  ;;  %v1608_v27 = vld [vmem:[%s2125_s5 + $0x50] sm:$0xff]  }
 0x325   :  { %v340_v30 = vsel %vm35_vm1, %v338_v28, %v312_v1  ;;  %v1609_v28 = vld [vmem:[%s2125_s5 + $0x58] sm:$0xff]  }
 0x326   :  { %v341_v31 = vpack.c.bf16 %v340_v30, %v339_v29  ;;  %v1610_v29 = vld [vmem:[%s2125_s5 + $0x60] sm:$0xff]   ;;  %v1611_v30 = vld [vmem:[%s2125_s5 + $0x68] sm:$0xff]  }
 0x328   :  { %1469 = vmatmul.mubr.bf16.vlgmr.msra.gmra.mrb[4].mxu0 %v341_v31  ;;  %v1612_v31 = vld [vmem:[%s2125_s5 + $0x70] sm:$0xff]  }
 0x329   :  { %1508 = vmatprep.mubr.msk.bf16.mxu0 %vm1671_vm0, %v1670_v0  ;;  %1493 = vmatpush3.bf16.msra.mxu0 %v1606_v11  ;;  %v1621_v11 = vld [vmem:[%s2123_s3 + $0xb8] sm:$0xff]  }
 0x32a   :  { %1494 = vmatprep.subr.bf16.mxu0 %v1670_v0 }
 0x32d   :  { %1495 = vmatpush3.bf16.msra.mxu0 %v1607_v12 }
 0x32e   :  { %1496 = vmatprep.subr.bf16.mxu0 %v1670_v0 }
 0x331   :  { %1497 = vmatpush3.bf16.msra.mxu0 %v1608_v27 }
 0x332   :  { %1498 = vmatprep.subr.bf16.mxu0 %v1670_v0 }
 0x335   :  { %1499 = vmatpush3.bf16.msra.mxu0 %v1609_v28 }
 0x336   :  { %1500 = vmatprep.subr.bf16.mxu0 %v1670_v0 }
 0x339   :  { %1501 = vmatpush3.bf16.msra.mxu0 %v1610_v29 }
 0x33a   :  { %1502 = vmatprep.subr.bf16.mxu0 %v1670_v0 }
 0x33d   :  { %1503 = vmatpush3.bf16.msra.mxu0 %v1611_v30 }
 0x33e   :  { %1504 = vmatprep.subr.bf16.mxu0 %v1670_v0 }
 0x341   :  { %1505 = vmatpush3.bf16.msra.mxu0 %v1612_v31 }
 0x342   :  { %1506 = vmatprep.subr.bf16.mxu0 %v1670_v0 }
 0x345   :  { %1507 = vmatpush3.bf16.msra.mxu0 %v1613_v32  ;;  %v1622_v32 = vld [vmem:[%s2125_s5 + $0x80] sm:$0xff]  }
 0x346   :  { %1532 = vmatprep.subr.bf16.mxu0 %v1670_v0 }
 0x3fb   :  { %v430_v35 = vpop.f32.mrb[4].mxu0 }
 0x3fc   :  { %v431_v36 = vadd.f32 %v1218_v34, %v430_v35  ;;  %v1470_v37 = vpop.f32.mrb[5].mxu0 }
 0x3fd   :  { %v433_v38 = vpop.f32.mrb[6].mxu0 }
 0x3fe   :  { %v437_v39 = vadd.f32 %v431_v36, %v1812_v51  ;;  %v434_v40 = vadd.f32 %v1218_v34, %v433_v38  ;;  %v1471_v41 = vpop.f32.mrb[7].mxu0  ;;  %v1602_v51 = vld [vmem:[%s2123_s3 + $0x60] sm:$0xff]  }
 0x3ff   :  { %1481 = vmatpush3.bf16.msra.mxu1 %v1602_v51 }
 0x400   :  { %v439_v42 = vmax.f32 %v437_v39, 0.0  ;;  %v438_v43 = vadd.f32 %v434_v40, %v1816_v52  ;;  %v1603_v52 = vld [vmem:[%s2123_s3 + $0x68] sm:$0xff]   ;;  %1482 = vmatprep.subr.bf16.mxu1 %v1670_v0 }
 0x402   :  { %v440_v44 = vmax.f32 %v438_v43, 0.0  ;;  %v441_v45 = vsel %vm35_vm1, 0.0, %v439_v42 }
 0x403   :  { %v443_v46 = vmul.f32 %v441_v45, %v441_v45  ;;  %1483 = vmatpush3.bf16.msra.mxu1 %v1603_v52  ;;  %v1614_v52 = vld [vmem:[%s2123_s3 + $0x80] sm:$0xff]  }
 0x404   :  { %v442_v47 = vsel %vm35_vm1, 0.0, %v440_v44  ;;  %1484 = vmatprep.subr.bf16.mxu1 %v1670_v0 }
 0x405   :  { %445 = vadd.xlane.f32.xlu0 %v443_v46  ;;  %v444_v48 = vmul.f32 %v442_v47, %v442_v47 }
 0x407   :  { %447 = vadd.xlane.f32.xlu1 %v444_v48  ;;  %1485 = vmatpush3.bf16.msra.mxu1 %v1604_v53  ;;  %v1615_v53 = vld [vmem:[%s2123_s3 + $0x88] sm:$0xff]  }
 0x408   :  { %1486 = vmatprep.subr.bf16.mxu1 %v1670_v0 }
 0x40b   :  { %1487 = vmatpush3.bf16.msra.mxu1 %v1605_v54  ;;  %v1270_v54 = vld [vmem:[%s2127_s6 + $0x1] ss:$0 sm:$0xff] }
 0x40c   :  { %1512 = vmatprep.subr.bf16.mxu1 %v1670_v0 }
 0x492   :  { %v446_v55 = vpop.xlane.xlu0 %445 }
 0x493   :  { %v449_v56 = vadd.f32 1.0, %v446_v55 }
 0x494   :  { %v448_v57 = vpop.xlane.xlu1 %447 }
 0x495   :  { %v451_v58 = vmax.f32 %v449_v56, 1e-08  ;;  %v450_v59 = vadd.f32 1.0, %v448_v57 }
 0x497   :  { %1646 = vrsqrt.f32 %v451_v58  ;;  %v452_v60 = vmax.f32 %v450_v59, 1e-08  ;;  %vm455_vm10 = vcmp.eq.f32.partialorder %v451_v58, inf  ;;  %v458_v1 = vand.u32 2147483648, %v451_v58 }
 0x498   :  { %vm457_vm11 = vcmp.eq.f32.partialorder %v451_v58, 0.0 }
 0x499   :  { %1648 = vrsqrt.f32 %v452_v60  ;;  %vm462_vm12 = vcmp.eq.f32.partialorder %v452_v60, inf  ;;  %v465_v5 = vand.u32 2147483648, %v452_v60  ;;  %vm464_vm13 = vcmp.eq.f32.partialorder %v452_v60, 0.0 }
 0x4a1   :  { %v1647_v61 = vpop.eup %1646 }
 0x4a2   :  { %v454_v62 = vmul.f32 %v1647_v61, %v451_v58 }
 0x4a3   :  { %v1649_v63 = vpop.eup %1648 }
 0x4a4   :  { %v456_v2 = vsel %vm455_vm10, %v451_v58, %v454_v62  ;;  %v461_v3 = vmul.f32 %v1649_v63, %v452_v60 }
 0x4a5   :  { %v459_v4 = vsel %vm457_vm11, %v458_v1, %v456_v2 }
 0x4a6   :  { %v463_v6 = vsel %vm462_vm12, %v452_v60, %v461_v3  ;;  %v1910_v8 = vsel %vm35_vm1, %v459_v4, %v439_v42 }
 0x4a7   :  { %v466_v7 = vsel %vm464_vm13, %v465_v5, %v463_v6  ;;  %v1616_v6 = vld [vmem:[%s2123_s3 + $0x90] sm:$0xff]  }
 0x4a8   :  { %v1914_v9 = vsel %vm35_vm1, %v466_v7, %v440_v44  ;;  %v1617_v7 = vld [vmem:[%s2123_s3 + $0x98] sm:$0xff]  }
 0x4a9   :  { %v507_v10 = vpack.c.bf16 %v1914_v9, %v1910_v8 }
 0x4ab   :  { %1489 = vmatmul.mubr.bf16.vlgmr.msra.gmra.mrb[4].mxu1 %v507_v10  ;;  %v1620_v10 = vld [vmem:[%s2123_s3 + $0xb0] sm:$0xff]  }
 0x4ac   :  { %1528 = vmatprep.mubr.msk.bf16.mxu1 %vm1671_vm0, %v1670_v0  ;;  %1513 = vmatpush3.bf16.msra.mxu1 %v1614_v52  ;;  %v1629_v52 = vld [vmem:[%s2125_s5 + $0xb8] sm:$0xff]  }
 0x4ad   :  { %1514 = vmatprep.subr.bf16.mxu1 %v1670_v0 }
 0x4b0   :  { %1515 = vmatpush3.bf16.msra.mxu1 %v1615_v53 }
 0x4b1   :  { %1516 = vmatprep.subr.bf16.mxu1 %v1670_v0 }
 0x4b4   :  { %1517 = vmatpush3.bf16.msra.mxu1 %v1616_v6 }
 0x4b5   :  { %1518 = vmatprep.subr.bf16.mxu1 %v1670_v0 }
 0x4b8   :  { %1519 = vmatpush3.bf16.msra.mxu1 %v1617_v7 }
 0x4b9   :  { %1520 = vmatprep.subr.bf16.mxu1 %v1670_v0 }
 0x57e   :  { %v596_v14 = vpop.f32.mrb[4].mxu1 }
 0x57f   :  { %v597_v15 = vadd.f32 %v1261_v13, %v596_v14  ;;  %v1490_v17 = vpop.f32.mrb[5].mxu1 }
 0x580   :  { %v599_v18 = vpop.f32.mrb[6].mxu1 }
 0x581   :  { %v603_v19 = vmax.f32 %v597_v15, 0.0  ;;  %v600_v20 = vadd.f32 %v1261_v13, %v599_v18  ;;  %v1491_v21 = vpop.f32.mrb[7].mxu1 }
 0x583   :  { %v604_v22 = vmax.f32 %v600_v20, 0.0  ;;  %v605_v23 = vsel %vm35_vm1, 0.0, %v603_v19 }
 0x584   :  { %v607_v24 = vmul.f32 %v605_v23, %v605_v23 }
 0x585   :  { %v606_v25 = vsel %vm35_vm1, 0.0, %v604_v22 }
 0x586   :  { %609 = vadd.xlane.f32.xlu0 %v607_v24  ;;  %v608_v26 = vmul.f32 %v606_v25, %v606_v25 }
 0x588   :  { %611 = vadd.xlane.f32.xlu1 %v608_v26 }
 0x613   :  { %v610_v33 = vpop.xlane.xlu0 %609 }
 0x614   :  { %v613_v34 = vadd.f32 1.0, %v610_v33  ;;  %v1623_v33 = vld [vmem:[%s2125_s5 + $0x88] sm:$0xff]  }
 0x615   :  { %v612_v35 = vpop.xlane.xlu1 %611 }
 0x616   :  { %v615_v36 = vmax.f32 %v613_v34, 1e-08  ;;  %v614_v37 = vadd.f32 1.0, %v612_v35  ;;  %v1313_v34 = vld [vmem:[%s2126_s4 + $0x2] ss:$0 sm:$0xff] }
 0x618   :  { %1650 = vrsqrt.f32 %v615_v36  ;;  %v616_v38 = vmax.f32 %v614_v37, 1e-08  ;;  %vm619_vm14 = vcmp.eq.f32.partialorder %v615_v36, inf  ;;  %v622_v42 = vand.u32 2147483648, %v615_v36 }
 0x619   :  { %vm621_vm15 = vcmp.eq.f32.partialorder %v615_v36, 0.0 }
 0x61a   :  { %1652 = vrsqrt.f32 %v616_v38  ;;  %vm626_vm2 = vcmp.eq.f32.partialorder %v616_v38, inf  ;;  %v629_v46 = vand.u32 2147483648, %v616_v38  ;;  %vm628_vm3 = vcmp.eq.f32.partialorder %v616_v38, 0.0 }
 0x622   :  { %v1651_v39 = vpop.eup %1650 }
 0x623   :  { %v618_v40 = vmul.f32 %v1651_v39, %v615_v36 }
 0x624   :  { %v1653_v41 = vpop.eup %1652 }
 0x625   :  { %v620_v43 = vsel %vm619_vm14, %v615_v36, %v618_v40  ;;  %v625_v44 = vmul.f32 %v1653_v41, %v616_v38 }
 0x626   :  { %v623_v45 = vsel %vm621_vm15, %v622_v42, %v620_v43 }
 0x627   :  { %v627_v47 = vsel %vm626_vm2, %v616_v38, %v625_v44  ;;  %v631_v49 = vsel %vm35_vm1, %v623_v45, %v603_v19 }
 0x628   :  { %v630_v48 = vsel %vm628_vm3, %v629_v46, %v627_v47  ;;  %v1624_v47 = vld [vmem:[%s2125_s5 + $0x90] sm:$0xff]  }
 0x629   :  { %v632_v50 = vsel %vm35_vm1, %v630_v48, %v604_v22  ;;  %v1625_v48 = vld [vmem:[%s2125_s5 + $0x98] sm:$0xff]  }
 0x62a   :  { %v633_v51 = vpack.c.bf16 %v632_v50, %v631_v49  ;;  %v1626_v49 = vld [vmem:[%s2125_s5 + $0xa0] sm:$0xff]   ;;  %v1627_v50 = vld [vmem:[%s2125_s5 + $0xa8] sm:$0xff]  }
 0x62c   :  { %1509 = vmatmul.mubr.bf16.vlgmr.msra.gmra.mrb[8].mxu0 %v633_v51  ;;  %v1628_v51 = vld [vmem:[%s2125_s5 + $0xb0] sm:$0xff]  }
 0x62d   :  { %1548 = vmatprep.mubr.msk.bf16.mxu0 %vm1671_vm0, %v1670_v0  ;;  %1533 = vmatpush3.bf16.msra.mxu0 %v1622_v32  ;;  %v1637_v32 = vld [vmem:[%s2128_s7 + $0x38] sm:$0xff]  }
 0x62e   :  { %1534 = vmatprep.subr.bf16.mxu0 %v1670_v0 }
 0x631   :  { %1535 = vmatpush3.bf16.msra.mxu0 %v1623_v33 }
 0x632   :  { %1536 = vmatprep.subr.bf16.mxu0 %v1670_v0 }
 0x635   :  { %1537 = vmatpush3.bf16.msra.mxu0 %v1624_v47 }
 0x636   :  { %1538 = vmatprep.subr.bf16.mxu0 %v1670_v0 }
 0x639   :  { %1539 = vmatpush3.bf16.msra.mxu0 %v1625_v48 }
 0x63a   :  { %1540 = vmatprep.subr.bf16.mxu0 %v1670_v0 }
 0x63d   :  { %1541 = vmatpush3.bf16.msra.mxu0 %v1626_v49 }
 0x63e   :  { %1542 = vmatprep.subr.bf16.mxu0 %v1670_v0 }
 0x641   :  { %1543 = vmatpush3.bf16.msra.mxu0 %v1627_v50 }
 0x642   :  { %1544 = vmatprep.subr.bf16.mxu0 %v1670_v0 }
 0x645   :  { %1545 = vmatpush3.bf16.msra.mxu0 %v1628_v51  ;;  %v1331_v51 = vld [vmem:[%s2129_s8] ss:$0 sm:$0xff] }
 0x646   :  { %1546 = vmatprep.subr.bf16.mxu0 %v1670_v0 }
 0x649   :  { %1547 = vmatpush3.bf16.msra.mxu0 %v1629_v52 }
 0x6ff   :  { %v722_v55 = vpop.f32.mrb[8].mxu0 }
 0x700   :  { %v723_v56 = vadd.f32 %v1270_v54, %v722_v55  ;;  %v1510_v57 = vpop.f32.mrb[9].mxu0 }
 0x701   :  { %v725_v58 = vpop.f32.mrb[10].mxu0 }
 0x702   :  { %v729_v59 = vadd.f32 %v723_v56, %v1910_v8  ;;  %v726_v60 = vadd.f32 %v1270_v54, %v725_v58  ;;  %v1511_v61 = vpop.f32.mrb[11].mxu0  ;;  %v1618_v8 = vld [vmem:[%s2123_s3 + $0xa0] sm:$0xff]  }
 0x703   :  { %1521 = vmatpush3.bf16.msra.mxu1 %v1618_v8 }
 0x704   :  { %v731_v62 = vmax.f32 %v729_v59, 0.0  ;;  %v730_v63 = vadd.f32 %v726_v60, %v1914_v9  ;;  %v1619_v9 = vld [vmem:[%s2123_s3 + $0xa8] sm:$0xff]   ;;  %1522 = vmatprep.subr.bf16.mxu1 %v1670_v0 }
 0x706   :  { %v732_v1 = vmax.f32 %v730_v63, 0.0  ;;  %v733_v2 = vsel %vm35_vm1, 0.0, %v731_v62 }
 0x707   :  { %v735_v3 = vmul.f32 %v733_v2, %v733_v2  ;;  %1523 = vmatpush3.bf16.msra.mxu1 %v1619_v9  ;;  %v1630_v9 = vld [vmem:[%s2128_s7] sm:$0xff]  }
 0x708   :  { %v734_v4 = vsel %vm35_vm1, 0.0, %v732_v1  ;;  %1524 = vmatprep.subr.bf16.mxu1 %v1670_v0 }
 0x709   :  { %737 = vadd.xlane.f32.xlu0 %v735_v3  ;;  %v736_v5 = vmul.f32 %v734_v4, %v734_v4 }
 0x70b   :  { %739 = vadd.xlane.f32.xlu1 %v736_v5  ;;  %1525 = vmatpush3.bf16.msra.mxu1 %v1620_v10  ;;  %v1631_v10 = vld [vmem:[%s2128_s7 + $0x8] sm:$0xff]  }
 0x70c   :  { %1526 = vmatprep.subr.bf16.mxu1 %v1670_v0 }
 0x70f   :  { %1527 = vmatpush3.bf16.msra.mxu1 %v1621_v11  ;;  %v1322_v11 = vld [vmem:[%s2127_s6 + $0x2] ss:$0 sm:$0xff] }
 0x710   :  { %1552 = vmatprep.subr.bf16.mxu1 %v1670_v0 }
 0x796   :  { %v738_v12 = vpop.xlane.xlu0 %737 }
 0x797   :  { %v741_v13 = vadd.f32 1.0, %v738_v12 }
 0x798   :  { %v740_v14 = vpop.xlane.xlu1 %739 }
 0x799   :  { %v743_v15 = vmax.f32 %v741_v13, 1e-08  ;;  %v742_v17 = vadd.f32 1.0, %v740_v14 }
 0x79b   :  { %1654 = vrsqrt.f32 %v743_v15  ;;  %v744_v18 = vmax.f32 %v742_v17, 1e-08  ;;  %vm747_vm4 = vcmp.eq.f32.partialorder %v743_v15, inf  ;;  %v750_v22 = vand.u32 2147483648, %v743_v15 }
 0x79c   :  { %vm749_vm5 = vcmp.eq.f32.partialorder %v743_v15, 0.0 }
 0x79d   :  { %1656 = vrsqrt.f32 %v744_v18  ;;  %vm754_vm6 = vcmp.eq.f32.partialorder %v744_v18, inf  ;;  %v757_v26 = vand.u32 2147483648, %v744_v18  ;;  %vm756_vm7 = vcmp.eq.f32.partialorder %v744_v18, 0.0 }
 0x7a5   :  { %v1655_v19 = vpop.eup %1654 }
 0x7a6   :  { %v746_v20 = vmul.f32 %v1655_v19, %v743_v15 }
 0x7a7   :  { %v1657_v21 = vpop.eup %1656 }
 0x7a8   :  { %v748_v23 = vsel %vm747_vm4, %v743_v15, %v746_v20  ;;  %v753_v24 = vmul.f32 %v1657_v21, %v744_v18 }
 0x7a9   :  { %v751_v25 = vsel %vm749_vm5, %v750_v22, %v748_v23 }
 0x7aa   :  { %v755_v27 = vsel %vm754_vm6, %v744_v18, %v753_v24  ;;  %v2008_v29 = vsel %vm35_vm1, %v751_v25, %v731_v62 }
 0x7ab   :  { %v758_v28 = vsel %vm756_vm7, %v757_v26, %v755_v27  ;;  %v1632_v27 = vld [vmem:[%s2128_s7 + $0x10] sm:$0xff]  }
 0x7ac   :  { %v2012_v30 = vsel %vm35_vm1, %v758_v28, %v732_v1  ;;  %v1633_v28 = vld [vmem:[%s2128_s7 + $0x18] sm:$0xff]  }
 0x7ad   :  { %v799_v31 = vpack.c.bf16 %v2012_v30, %v2008_v29 }
 0x7af   :  { %1529 = vmatmul.mubr.bf16.vlgmr.msra.gmra.mrb[8].mxu1 %v799_v31  ;;  %v1636_v31 = vld [vmem:[%s2128_s7 + $0x30] sm:$0xff]  }
 0x7b0   :  { %1568 = vmatprep.mubr.msk.bf16.mxu1 %vm1671_vm0, %v1670_v0  ;;  %1553 = vmatpush3.bf16.msra.mxu1 %v1630_v9 }
 0x7b1   :  { %1554 = vmatprep.subr.bf16.mxu1 %v1670_v0 }
 0x7b4   :  { %1555 = vmatpush3.bf16.msra.mxu1 %v1631_v10 }
 0x7b5   :  { %1556 = vmatprep.subr.bf16.mxu1 %v1670_v0 }
 0x7b8   :  { %1557 = vmatpush3.bf16.msra.mxu1 %v1632_v27 }
 0x7b9   :  { %1558 = vmatprep.subr.bf16.mxu1 %v1670_v0 }
 0x7bc   :  { %1559 = vmatpush3.bf16.msra.mxu1 %v1633_v28 }
 0x7bd   :  { %1560 = vmatprep.subr.bf16.mxu1 %v1670_v0 }
 0x882   :  { %v888_v35 = vpop.f32.mrb[8].mxu1 }
 0x883   :  { %v889_v36 = vadd.f32 %v1313_v34, %v888_v35  ;;  %v1530_v37 = vpop.f32.mrb[9].mxu1 }
 0x884   :  { %v891_v38 = vpop.f32.mrb[10].mxu1 }
 0x885   :  { %v895_v39 = vmax.f32 %v889_v36, 0.0  ;;  %v892_v40 = vadd.f32 %v1313_v34, %v891_v38  ;;  %v1531_v41 = vpop.f32.mrb[11].mxu1 }
 0x887   :  { %v896_v42 = vmax.f32 %v892_v40, 0.0  ;;  %v897_v43 = vsel %vm35_vm1, 0.0, %v895_v39 }
 0x888   :  { %v899_v44 = vmul.f32 %v897_v43, %v897_v43 }
 0x889   :  { %v898_v45 = vsel %vm35_vm1, 0.0, %v896_v42 }
 0x88a   :  { %901 = vadd.xlane.f32.xlu0 %v899_v44  ;;  %v900_v46 = vmul.f32 %v898_v45, %v898_v45 }
 0x88c   :  { %903 = vadd.xlane.f32.xlu1 %v900_v46 }
 0x917   :  { %v902_v53 = vpop.xlane.xlu0 %901 }
 0x918   :  { %v905_v54 = vadd.f32 1.0, %v902_v53 }
 0x919   :  { %v904_v55 = vpop.xlane.xlu1 %903 }
 0x91a   :  { %v907_v56 = vmax.f32 %v905_v54, 1e-08  ;;  %v906_v57 = vadd.f32 1.0, %v904_v55 }
 0x91c   :  { %1658 = vrsqrt.f32 %v907_v56  ;;  %v908_v58 = vmax.f32 %v906_v57, 1e-08  ;;  %vm911_vm0 = vcmp.eq.f32.partialorder %v907_v56, inf  ;;  %v914_v62 = vand.u32 2147483648, %v907_v56 }
 0x91d   :  { %vm913_vm8 = vcmp.eq.f32.partialorder %v907_v56, 0.0 }
 0x91e   :  { %1660 = vrsqrt.f32 %v908_v58  ;;  %vm918_vm9 = vcmp.eq.f32.partialorder %v908_v58, inf  ;;  %v921_v3 = vand.u32 2147483648, %v908_v58  ;;  %vm920_vm10 = vcmp.eq.f32.partialorder %v908_v58, 0.0 }
 0x926   :  { %v1659_v59 = vpop.eup %1658 }
 0x927   :  { %v910_v60 = vmul.f32 %v1659_v59, %v907_v56 }
 0x928   :  { %v1661_v61 = vpop.eup %1660 }
 0x929   :  { %v912_v63 = vsel %vm911_vm0, %v907_v56, %v910_v60  ;;  %v917_v1 = vmul.f32 %v1661_v61, %v908_v58 }
 0x92a   :  { %v915_v2 = vsel %vm913_vm8, %v914_v62, %v912_v63 }
 0x92b   :  { %v919_v4 = vsel %vm918_vm9, %v908_v58, %v917_v1  ;;  %v923_v6 = vsel %vm35_vm1, %v915_v2, %v895_v39 }
 0x92c   :  { %v922_v5 = vsel %vm920_vm10, %v921_v3, %v919_v4 }
 0x92d   :  { %v924_v7 = vsel %vm35_vm1, %v922_v5, %v896_v42 }
 0x92e   :  { %v925_v8 = vpack.c.bf16 %v924_v7, %v923_v6 }
 0x930   :  { %1549 = vmatmul.mubr.bf16.vlgmr.msra.gmra.mrb[12].mxu0 %v925_v8 }
 0xa03   :  { %v1014_v12 = vpop.f32.mrb[12].mxu0 }
 0xa04   :  { %v1015_v13 = vadd.f32 %v1322_v11, %v1014_v12  ;;  %v1550_v14 = vpop.f32.mrb[13].mxu0 }
 0xa05   :  { %v1017_v15 = vpop.f32.mrb[14].mxu0 }
 0xa06   :  { %v1021_v17 = vadd.f32 %v1015_v13, %v2008_v29  ;;  %v1018_v18 = vadd.f32 %v1322_v11, %v1017_v15  ;;  %v1551_v19 = vpop.f32.mrb[15].mxu0  ;;  %v1634_v29 = vld [vmem:[%s2128_s7 + $0x20] sm:$0xff]  }
 0xa07   :  { %1561 = vmatpush3.bf16.msra.mxu1 %v1634_v29 }
 0xa08   :  { %v1023_v20 = vmax.f32 %v1021_v17, 0.0  ;;  %v1022_v21 = vadd.f32 %v1018_v18, %v2012_v30  ;;  %v1635_v30 = vld [vmem:[%s2128_s7 + $0x28] sm:$0xff]   ;;  %1562 = vmatprep.subr.bf16.mxu1 %v1670_v0 }
 0xa0a   :  { %v1024_v22 = vmax.f32 %v1022_v21, 0.0  ;;  %v1025_v23 = vsel %vm35_vm1, 0.0, %v1023_v20 }
 0xa0b   :  { %v1027_v24 = vmul.f32 %v1025_v23, %v1025_v23  ;;  %1563 = vmatpush3.bf16.msra.mxu1 %v1635_v30 }
 0xa0c   :  { %v1026_v25 = vsel %vm35_vm1, 0.0, %v1024_v22  ;;  %1564 = vmatprep.subr.bf16.mxu1 %v1670_v0 }
 0xa0d   :  { %1029 = vadd.xlane.f32.xlu0 %v1027_v24  ;;  %v1028_v26 = vmul.f32 %v1026_v25, %v1026_v25 }
 0xa0f   :  { %1031 = vadd.xlane.f32.xlu1 %v1028_v26  ;;  %1565 = vmatpush3.bf16.msra.mxu1 %v1636_v31 }
 0xa10   :  { %1566 = vmatprep.subr.bf16.mxu1 %v1670_v0 }
 0xa13   :  { %1567 = vmatpush3.bf16.msra.mxu1 %v1637_v32 }
 0xa9a   :  { %v1030_v33 = vpop.xlane.xlu0 %1029 }
 0xa9b   :  { %v1033_v34 = vadd.f32 1.0, %v1030_v33 }
 0xa9c   :  { %v1032_v35 = vpop.xlane.xlu1 %1031 }
 0xa9d   :  { %v1035_v36 = vmax.f32 %v1033_v34, 1e-08  ;;  %v1034_v37 = vadd.f32 1.0, %v1032_v35 }
 0xa9f   :  { %1662 = vrsqrt.f32 %v1035_v36  ;;  %v1036_v38 = vmax.f32 %v1034_v37, 1e-08  ;;  %vm1039_vm11 = vcmp.eq.f32.partialorder %v1035_v36, inf  ;;  %v1042_v42 = vand.u32 2147483648, %v1035_v36 }
 0xaa0   :  { %vm1041_vm12 = vcmp.eq.f32.partialorder %v1035_v36, 0.0 }
 0xaa1   :  { %1664 = vrsqrt.f32 %v1036_v38  ;;  %vm1046_vm13 = vcmp.eq.f32.partialorder %v1036_v38, inf  ;;  %v1049_v0 = vand.u32 2147483648, %v1036_v38  ;;  %vm1048_vm14 = vcmp.eq.f32.partialorder %v1036_v38, 0.0 }
 0xaa9   :  { %v1663_v39 = vpop.eup %1662 }
 0xaaa   :  { %v1038_v40 = vmul.f32 %v1663_v39, %v1035_v36 }
 0xaab   :  { %v1665_v41 = vpop.eup %1664 }
 0xaac   :  { %v1040_v43 = vsel %vm1039_vm11, %v1035_v36, %v1038_v40  ;;  %v1045_v44 = vmul.f32 %v1665_v41, %v1036_v38 }
 0xaad   :  { %v1043_v45 = vsel %vm1041_vm12, %v1042_v42, %v1040_v43 }
 0xaae   :  { %v1047_v46 = vsel %vm1046_vm13, %v1036_v38, %v1045_v44  ;;  %v1051_v48 = vsel %vm35_vm1, %v1043_v45, %v1023_v20 }
 0xaaf   :  { %v1050_v47 = vsel %vm1048_vm14, %v1049_v0, %v1047_v46 }
 0xab0   :  { %v1052_v49 = vsel %vm35_vm1, %v1050_v47, %v1024_v22 }
 0xab1   :  { %v1070_v50 = vpack.c.bf16 %v1052_v49, %v1051_v48 }
 0xab3   :  { %1569 = vmatmul.mubr.bf16.vlgmr.msra.gmra.mrb[12].mxu1 %v1070_v50 }
 0xb86   :  { %v1159_v52 = vpop.f32.mrb[12].mxu1 }
 0xb87   :  { %v1160_v53 = vadd.f32 %v1331_v51, %v1159_v52  ;;  %v1570_v54 = vpop.f32.mrb[13].mxu1 }
 0xb88   :  { %v1162_v55 = vpop.f32.mrb[14].mxu1 }
 0xb89   :  { %v1163_v56 = vadd.f32 %v1331_v51, %v1162_v55  ;;  %v1571_v57 = vpop.f32.mrb[15].mxu1  ;;  %v1166_v58 = vsel %vm35_vm1, 0.0, %v1160_v53 }
 0xb8a   :  { %v1168_v59 = vmul.f32 %v1166_v58, %v1166_v58 }
 0xb8b   :  { %v1167_v60 = vsel %vm35_vm1, 0.0, %v1163_v56 }
 0xb8c   :  { %1170 = vadd.xlane.f32.xlu0 %v1168_v59  ;;  %v1169_v61 = vmul.f32 %v1167_v60, %v1167_v60 }
 0xb8e   :  { %1172 = vadd.xlane.f32.xlu1 %v1169_v61 }
 0xc19   :  { %v1171_v62 = vpop.xlane.xlu0 %1170 }
 0xc1a   :  { %v1174_v63 = vadd.f32 1.0, %v1171_v62 }
 0xc1b   :  { %v1173_v1 = vpop.xlane.xlu1 %1172 }
 0xc1c   :  { %v1176_v2 = vmax.f32 %v1174_v63, 1e-08  ;;  %v1175_v3 = vadd.f32 1.0, %v1173_v1 }
 0xc1e   :  { %1666 = vrsqrt.f32 %v1176_v2  ;;  %v1177_v4 = vmax.f32 %v1175_v3, 1e-08  ;;  %vm1180_vm15 = vcmp.eq.f32.partialorder %v1176_v2, inf  ;;  %v1183_v7 = vand.u32 2147483648, %v1176_v2 }
 0xc1f   :  { %vm1182_vm2 = vcmp.eq.f32.partialorder %v1176_v2, 0.0 }
 0xc20   :  { %1668 = vrsqrt.f32 %v1177_v4  ;;  %vm1187_vm3 = vcmp.eq.f32.partialorder %v1177_v4, inf  ;;  %v1190_v13 = vand.u32 2147483648, %v1177_v4  ;;  %vm1189_vm4 = vcmp.eq.f32.partialorder %v1177_v4, 0.0 }
 0xc28   :  { %v1667_v5 = vpop.eup %1666 }
 0xc29   :  { %v1179_v6 = vmul.f32 %v1667_v5, %v1176_v2 }
 0xc2a   :  { %v1669_v8 = vpop.eup %1668 }
 0xc2b   :  { %v1181_v9 = vsel %vm1180_vm15, %v1176_v2, %v1179_v6  ;;  %v1186_v11 = vmul.f32 %v1669_v8, %v1177_v4 }
 0xc2c   :  { %v1184_v10 = vsel %vm1182_vm2, %v1183_v7, %v1181_v9 }
 0xc2d   :  { %v1192_v12 = vsel %vm35_vm1, %v1184_v10, %v1160_v53  ;;  %v1188_v14 = vsel %vm1187_vm3, %v1177_v4, %v1186_v11 }
 0xc2e   :  { %1194 = vst [vmem:[%s2130_s9] sm:$0xff] %v1192_v12  ;;  %v1191_v15 = vsel %vm1189_vm4, %v1190_v13, %v1188_v14 }
 0xc2f   :  { %v1193_v17 = vsel %vm35_vm1, %v1191_v15, %v1163_v56 }
 0xc30   :  { %1195 = vst [vmem:[%s2130_s9 + $0x8] sm:$0xff] %v1193_v17 }

// kernel: fully_connected_resnet.1
= control target key start
LH: loop header
LB: loop body
LE: loop exit
PB: predicated region body
PF: predicated region fallthrough
CT: control target
= control target key end

     0   :  { %v1670_v0 = vmov 0.0   ;;  %vm1671_vm0 = vmmov 0   ;;  %v33_v14 = vlaneseq  ;;  %s2121_s1 = inlined_call_operand.vmem [shape: bf16[128,128], index: 1, kind: input, shape index: {}]   ;;  %s2122_s0 = inlined_call_operand.vmem [shape: f32[16,128], index: 0, kind: input, shape index: {}]   ;;  %s2123_s3 = inlined_call_operand.vmem [shape: bf16[3,128,128], index: 3, kind: input, shape index: {}]   ;;  %s2124_s2 = inlined_call_operand.vmem [shape: f32[1,128], index: 2, kind: input, shape index: {}]   ;;  %s2125_s5 = inlined_call_operand.vmem [shape: bf16[3,128,128], index: 5, kind: input, shape index: {}]   ;;  %s2126_s4 = inlined_call_operand.vmem [shape: f32[3,1,128], index: 4, kind: input, shape index: {}]   ;;  %s2127_s6 = inlined_call_operand.vmem [shape: f32[3,1,128], index: 6, kind: input, shape index: {}]   ;;  %s2128_s7 = inlined_call_operand.vmem [shape: bf16[128,128], index: 7, kind: input, shape index: {}]   ;;  %s2129_s8 = inlined_call_operand.vmem [shape: f32[1,128], index: 8, kind: input, shape index: {}]   ;;  %s2130_s9 = inlined_call_operand.vmem [shape: f32[16,128], index: 9, kind: output, shape index: {}]  }
   0x1   :  { %1412 = vmatprep.subr.bf16.mxu0 %v1670_v0  ;;  %v1574_v1 = vld [vmem:[%s2121_s1] sm:$0xff]   ;;  %1428 = vmatprep.mubr.msk.bf16.mxu0 %vm1671_vm0, %v1670_v0  ;;  %v1575_v2 = vld [vmem:[%s2121_s1 + $0x8] sm:$0xff]   ;;  %v1576_v3 = vld [vmem:[%s2121_s1 + $0x10] sm:$0xff]  }
   0x2   :  { %1432 = vmatprep.subr.bf16.mxu1 %v1670_v0  ;;  %1448 = vmatprep.mubr.msk.bf16.mxu1 %vm1671_vm0, %v1670_v0  ;;  %v1577_v4 = vld [vmem:[%s2121_s1 + $0x18] sm:$0xff]   ;;  %v1578_v5 = vld [vmem:[%s2121_s1 + $0x20] sm:$0xff]   ;;  %v1579_v6 = vld [vmem:[%s2121_s1 + $0x28] sm:$0xff]   ;;  %v1779_v16 = vand.u32 127, %v33_v14 }
   0x3   :  { %1413 = vmatpush3.bf16.msra.mxu0 %v1574_v1  ;;  %v1580_v7 = vld [vmem:[%s2121_s1 + $0x30] sm:$0xff]   ;;  %v1581_v8 = vld [vmem:[%s2121_s1 + $0x38] sm:$0xff]   ;;  %v36_v9 = vld [vmem:[%s2122_s0] sm:$0xff] }
   0x4   :  { %1414 = vmatprep.subr.bf16.mxu0 %v1670_v0  ;;  %v37_v10 = vld [vmem:[%s2122_s0 + $0x8] sm:$0xff]  ;;  %v1582_v12 = vld [vmem:[%s2123_s3] sm:$0xff]   ;;  %vm35_vm1 = vcmp.eq.s32.totalorder %v1779_v16, 0  ;;  %v1584_v29 = vld [vmem:[%s2123_s3 + $0x10] sm:$0xff]  }
   0x5   :  { %v55_v11 = vpack.c.bf16 %v37_v10, %v36_v9  ;;  %v1583_v13 = vld [vmem:[%s2123_s3 + $0x8] sm:$0xff]   ;;  %1433 = vmatpush3.bf16.msra.mxu1 %v1582_v12  ;;  %v1200_v15 = vld [vmem:[%s2124_s2] ss:$0 sm:$0xff]  ;;  %v1585_v30 = vld [vmem:[%s2123_s3 + $0x18] sm:$0xff]  }
   0x6   :  { %1434 = vmatprep.subr.bf16.mxu1 %v1670_v0  ;;  %v1586_v31 = vld [vmem:[%s2123_s3 + $0x20] sm:$0xff]   ;;  %v1587_v32 = vld [vmem:[%s2123_s3 + $0x28] sm:$0xff]   ;;  %v1588_v33 = vld [vmem:[%s2123_s3 + $0x30] sm:$0xff]  }
   0x7   :  { %1415 = vmatpush3.bf16.msra.mxu0 %v1575_v2  ;;  %v1589_v34 = vld [vmem:[%s2123_s3 + $0x38] sm:$0xff]   ;;  %v1590_v54 = vld [vmem:[%s2125_s5] sm:$0xff]   ;;  %v1591_v55 = vld [vmem:[%s2125_s5 + $0x8] sm:$0xff]  }
   0x8   :  { %1416 = vmatprep.subr.bf16.mxu0 %v1670_v0  ;;  %v1209_v56 = vld [vmem:[%s2126_s4] ss:$0 sm:$0xff]  ;;  %v1595_v9 = vld [vmem:[%s2125_s5 + $0x28] sm:$0xff]   ;;  %v1596_v10 = vld [vmem:[%s2125_s5 + $0x30] sm:$0xff]  }
   0x9   :  { %1435 = vmatpush3.bf16.msra.mxu1 %v1583_v13 }
   0xa   :  { %1436 = vmatprep.subr.bf16.mxu1 %v1670_v0 }
   0xb   :  { %1417 = vmatpush3.bf16.msra.mxu0 %v1576_v3 }
   0xc   :  { %1418 = vmatprep.subr.bf16.mxu0 %v1670_v0 }
   0xd   :  { %1437 = vmatpush3.bf16.msra.mxu1 %v1584_v29 }
   0xe   :  { %1438 = vmatprep.subr.bf16.mxu1 %v1670_v0 }
   0xf   :  { %1419 = vmatpush3.bf16.msra.mxu0 %v1577_v4 }
  0x10   :  { %1420 = vmatprep.subr.bf16.mxu0 %v1670_v0 }
  0x11   :  { %1439 = vmatpush3.bf16.msra.mxu1 %v1585_v30 }
  0x12   :  { %1440 = vmatprep.subr.bf16.mxu1 %v1670_v0 }
  0x13   :  { %1421 = vmatpush3.bf16.msra.mxu0 %v1578_v5 }
  0x14   :  { %1422 = vmatprep.subr.bf16.mxu0 %v1670_v0 }
  0x15   :  { %1441 = vmatpush3.bf16.msra.mxu1 %v1586_v31 }
  0x16   :  { %1442 = vmatprep.subr.bf16.mxu1 %v1670_v0 }
  0x17   :  { %1423 = vmatpush3.bf16.msra.mxu0 %v1579_v6  ;;  %v1592_v6 = vld [vmem:[%s2125_s5 + $0x10] sm:$0xff]  }
  0x18   :  { %1424 = vmatprep.subr.bf16.mxu0 %v1670_v0 }
  0x19   :  { %1443 = vmatpush3.bf16.msra.mxu1 %v1587_v32  ;;  %v1598_v32 = vld [vmem:[%s2123_s3 + $0x40] sm:$0xff]  }
  0x1a   :  { %1444 = vmatprep.subr.bf16.mxu1 %v1670_v0 }
  0x1b   :  { %1425 = vmatpush3.bf16.msra.mxu0 %v1580_v7  ;;  %v1593_v7 = vld [vmem:[%s2125_s5 + $0x18] sm:$0xff]  }
  0x1c   :  { %1426 = vmatprep.subr.bf16.mxu0 %v1670_v0 }
  0x1d   :  { %1445 = vmatpush3.bf16.msra.mxu1 %v1588_v33  ;;  %v1599_v33 = vld [vmem:[%s2123_s3 + $0x48] sm:$0xff]  }
  0x1e   :  { %1446 = vmatprep.subr.bf16.mxu1 %v1670_v0 }
  0x1f   :  { %1427 = vmatpush3.bf16.msra.mxu0 %v1581_v8  ;;  %v1594_v8 = vld [vmem:[%s2125_s5 + $0x20] sm:$0xff]  }
  0x20   :  { %1452 = vmatprep.subr.bf16.mxu0 %v1670_v0 }
  0x21   :  { %1447 = vmatpush3.bf16.msra.mxu1 %v1589_v34  ;;  %v1218_v34 = vld [vmem:[%s2127_s6] ss:$0 sm:$0xff] }
  0x22   :  { %1429 = vmatmul.mubr.bf16.vlgmr.msra.gmra.mrb[0].mxu0 %v55_v11  ;;  %1472 = vmatprep.subr.bf16.mxu1 %v1670_v0  ;;  %v1597_v11 = vld [vmem:[%s2125_s5 + $0x38] sm:$0xff]  }
  0x23   :  { %1468 = vmatprep.mubr.msk.bf16.mxu0 %vm1671_vm0, %v1670_v0  ;;  %1453 = vmatpush3.bf16.msra.mxu0 %v1590_v54  ;;  %v1605_v54 = vld [vmem:[%s2123_s3 + $0x78] sm:$0xff]  }
  0x24   :  { %1454 = vmatprep.subr.bf16.mxu0 %v1670_v0 }
  0x27   :  { %1455 = vmatpush3.bf16.msra.mxu0 %v1591_v55 }
  0x28   :  { %1456 = vmatprep.subr.bf16.mxu0 %v1670_v0 }
  0x2b   :  { %1457 = vmatpush3.bf16.msra.mxu0 %v1592_v6 }
  0x2c   :  { %1458 = vmatprep.subr.bf16.mxu0 %v1670_v0 }
  0x2f   :  { %1459 = vmatpush3.bf16.msra.mxu0 %v1593_v7 }
  0x30   :  { %1460 = vmatprep.subr.bf16.mxu0 %v1670_v0 }
  0x33   :  { %1461 = vmatpush3.bf16.msra.mxu0 %v1594_v8 }
  0x34   :  { %1462 = vmatprep.subr.bf16.mxu0 %v1670_v0 }
  0x37   :  { %1463 = vmatpush3.bf16.msra.mxu0 %v1595_v9 }
  0x38   :  { %1464 = vmatprep.subr.bf16.mxu0 %v1670_v0 }
  0x3b   :  { %1465 = vmatpush3.bf16.msra.mxu0 %v1596_v10 }
  0x3c   :  { %1466 = vmatprep.subr.bf16.mxu0 %v1670_v0 }
  0x3f   :  { %1467 = vmatpush3.bf16.msra.mxu0 %v1597_v11  ;;  %v1606_v11 = vld [vmem:[%s2125_s5 + $0x40] sm:$0xff]  }
  0x40   :  { %1492 = vmatprep.subr.bf16.mxu0 %v1670_v0 }
  0xf5   :  { %v144_v17 = vpop.f32.mrb[0].mxu0 }
  0xf6   :  { %v145_v18 = vadd.f32 %v1200_v15, %v144_v17  ;;  %v1430_v19 = vpop.f32.mrb[1].mxu0 }
  0xf7   :  { %v147_v20 = vpop.f32.mrb[2].mxu0 }
  0xf8   :  { %v151_v21 = vmax.f32 %v145_v18, 0.0  ;;  %v148_v22 = vadd.f32 %v1200_v15, %v147_v20  ;;  %v1431_v23 = vpop.f32.mrb[3].mxu0 }
  0xfa   :  { %v152_v24 = vmax.f32 %v148_v22, 0.0  ;;  %v153_v25 = vsel %vm35_vm1, 0.0, %v151_v21 }
  0xfb   :  { %v155_v26 = vmul.f32 %v153_v25, %v153_v25 }
  0xfc   :  { %v154_v27 = vsel %vm35_vm1, 0.0, %v152_v24 }
  0xfd   :  { %157 = vadd.xlane.f32.xlu0 %v155_v26  ;;  %v156_v28 = vmul.f32 %v154_v27, %v154_v27 }
 0x101   :  { %159 = vadd.xlane.f32.xlu0 %v156_v28 }
 0x18a   :  { %v158_v35 = vpop.xlane.xlu0 %157 }
 0x18b   :  { %v161_v36 = vadd.f32 1.0, %v158_v35 }
 0x18d   :  { %v163_v37 = vmax.f32 %v161_v36, 1e-08 }
 0x18e   :  { %v160_v38 = vpop.xlane.xlu0 %159 }
 0x18f   :  { %1638 = vrsqrt.f32 %v163_v37  ;;  %v162_v39 = vadd.f32 1.0, %v160_v38  ;;  %vm167_vm2 = vcmp.eq.f32.partialorder %v163_v37, inf  ;;  %v170_v45 = vand.u32 2147483648, %v163_v37 }
 0x190   :  { %vm169_vm3 = vcmp.eq.f32.partialorder %v163_v37, 0.0 }
 0x191   :  { %v164_v40 = vmax.f32 %v162_v39, 1e-08 }
 0x193   :  { %1640 = vrsqrt.f32 %v164_v40  ;;  %vm174_vm4 = vcmp.eq.f32.partialorder %v164_v40, inf  ;;  %v177_v48 = vand.u32 2147483648, %v164_v40  ;;  %vm176_vm5 = vcmp.eq.f32.partialorder %v164_v40, 0.0 }
 0x199   :  { %v1639_v41 = vpop.eup %1638 }
 0x19a   :  { %v166_v42 = vmul.f32 %v1639_v41, %v163_v37 }
 0x19c   :  { %v168_v43 = vsel %vm167_vm2, %v163_v37, %v166_v42 }
 0x19d   :  { %v1641_v44 = vpop.eup %1640  ;;  %v171_v47 = vsel %vm169_vm3, %v170_v45, %v168_v43 }
 0x19e   :  { %v173_v46 = vmul.f32 %v1641_v44, %v164_v40  ;;  %v1812_v51 = vsel %vm35_vm1, %v171_v47, %v151_v21 }
 0x1a0   :  { %v175_v49 = vsel %vm174_vm4, %v164_v40, %v173_v46 }
 0x1a1   :  { %v178_v50 = vsel %vm176_vm5, %v177_v48, %v175_v49  ;;  %v1600_v49 = vld [vmem:[%s2123_s3 + $0x50] sm:$0xff]  }
 0x1a2   :  { %v1816_v52 = vsel %vm35_vm1, %v178_v50, %v152_v24  ;;  %v1601_v50 = vld [vmem:[%s2123_s3 + $0x58] sm:$0xff]  }
 0x1a3   :  { %v215_v53 = vpack.c.bf16 %v1816_v52, %v1812_v51 }
 0x1a5   :  { %1449 = vmatmul.mubr.bf16.vlgmr.msra.gmra.mrb[0].mxu1 %v215_v53  ;;  %v1604_v53 = vld [vmem:[%s2123_s3 + $0x70] sm:$0xff]  }
 0x1a6   :  { %1488 = vmatprep.mubr.msk.bf16.mxu1 %vm1671_vm0, %v1670_v0  ;;  %1473 = vmatpush3.bf16.msra.mxu1 %v1598_v32  ;;  %v1613_v32 = vld [vmem:[%s2125_s5 + $0x78] sm:$0xff]  }
 0x1a7   :  { %1474 = vmatprep.subr.bf16.mxu1 %v1670_v0 }
 0x1aa   :  { %1475 = vmatpush3.bf16.msra.mxu1 %v1599_v33 }
 0x1ab   :  { %1476 = vmatprep.subr.bf16.mxu1 %v1670_v0 }
 0x1ae   :  { %1477 = vmatpush3.bf16.msra.mxu1 %v1600_v49 }
 0x1af   :  { %1478 = vmatprep.subr.bf16.mxu1 %v1670_v0 }
 0x1b2   :  { %1479 = vmatpush3.bf16.msra.mxu1 %v1601_v50 }
 0x1b3   :  { %1480 = vmatprep.subr.bf16.mxu1 %v1670_v0 }
 0x278   :  { %v304_v57 = vpop.f32.mrb[0].mxu1 }
 0x279   :  { %v305_v58 = vadd.f32 %v1209_v56, %v304_v57  ;;  %v1450_v59 = vpop.f32.mrb[1].mxu1 }
 0x27a   :  { %v307_v60 = vpop.f32.mrb[2].mxu1 }
 0x27b   :  { %v311_v61 = vmax.f32 %v305_v58, 0.0  ;;  %v308_v62 = vadd.f32 %v1209_v56, %v307_v60  ;;  %v1451_v63 = vpop.f32.mrb[3].mxu1 }
 0x27d   :  { %v312_v1 = vmax.f32 %v308_v62, 0.0  ;;  %v313_v2 = vsel %vm35_vm1, 0.0, %v311_v61 }
 0x27e   :  { %v315_v3 = vmul.f32 %v313_v2, %v313_v2 }
 0x27f   :  { %v314_v4 = vsel %vm35_vm1, 0.0, %v312_v1 }
 0x280   :  { %317 = vadd.xlane.f32.xlu1 %v315_v3  ;;  %v316_v5 = vmul.f32 %v314_v4, %v314_v4 }
 0x284   :  { %319 = vadd.xlane.f32.xlu1 %v316_v5 }
 0x30d   :  { %v318_v12 = vpop.xlane.xlu1 %317 }
 0x30e   :  { %v321_v13 = vadd.f32 1.0, %v318_v12  ;;  %v1607_v12 = vld [vmem:[%s2125_s5 + $0x48] sm:$0xff]  }
 0x310   :  { %v323_v14 = vmax.f32 %v321_v13, 1e-08  ;;  %v1261_v13 = vld [vmem:[%s2126_s4 + $0x1] ss:$0 sm:$0xff] }
 0x311   :  { %v320_v15 = vpop.xlane.xlu1 %319 }
 0x312   :  { %1642 = vrsqrt.f32 %v323_v14  ;;  %v322_v17 = vadd.f32 1.0, %v320_v15  ;;  %vm327_vm6 = vcmp.eq.f32.partialorder %v323_v14, inf  ;;  %v330_v23 = vand.u32 2147483648, %v323_v14 }
 0x313   :  { %vm329_vm7 = vcmp.eq.f32.partialorder %v323_v14, 0.0 }
 0x314   :  { %v324_v18 = vmax.f32 %v322_v17, 1e-08 }
 0x316   :  { %1644 = vrsqrt.f32 %v324_v18  ;;  %vm334_vm8 = vcmp.eq.f32.partialorder %v324_v18, inf  ;;  %v337_v26 = vand.u32 2147483648, %v324_v18  ;;  %vm336_vm9 = vcmp.eq.f32.partialorder %v324_v18, 0.0 }
 0x31c   :  { %v1643_v19 = vpop.eup %1642 }
 0x31d   :  { %v326_v20 = vmul.f32 %v1643_v19, %v323_v14 }
 0x31f   :  { %v328_v21 = vsel %vm327_vm6, %v323_v14, %v326_v20 }
 0x320   :  { %v1645_v22 = vpop.eup %1644  ;;  %v331_v25 = vsel %vm329_vm7, %v330_v23, %v328_v21 }
 0x321   :  { %v333_v24 = vmul.f32 %v1645_v22, %v324_v18  ;;  %v339_v29 = vsel %vm35_vm1, %v331_v25, %v311_v61 }
 0x323   :  { %v335_v27 = vsel %vm334_vm8, %v324_v18, %v333_v24 }
 0x324   :  { %v338_v28 = vsel %vm336_vm9, %v337_v26, %v335_v27  ;;  %v1608_v27 = vld [vmem:[%s2125_s5 + $0x50] sm:$0xff]  }
 0x325   :  { %v340_v30 = vsel %vm35_vm1, %v338_v28, %v312_v1  ;;  %v1609_v28 = vld [vmem:[%s2125_s5 + $0x58] sm:$0xff]  }
 0x326   :  { %v341_v31 = vpack.c.bf16 %v340_v30, %v339_v29  ;;  %v1610_v29 = vld [vmem:[%s2125_s5 + $0x60] sm:$0xff]   ;;  %v1611_v30 = vld [vmem:[%s2125_s5 + $0x68] sm:$0xff]  }
 0x328   :  { %1469 = vmatmul.mubr.bf16.vlgmr.msra.gmra.mrb[4].mxu0 %v341_v31  ;;  %v1612_v31 = vld [vmem:[%s2125_s5 + $0x70] sm:$0xff]  }
 0x329   :  { %1508 = vmatprep.mubr.msk.bf16.mxu0 %vm1671_vm0, %v1670_v0  ;;  %1493 = vmatpush3.bf16.msra.mxu0 %v1606_v11  ;;  %v1621_v11 = vld [vmem:[%s2123_s3 + $0xb8] sm:$0xff]  }
 0x32a   :  { %1494 = vmatprep.subr.bf16.mxu0 %v1670_v0 }
 0x32d   :  { %1495 = vmatpush3.bf16.msra.mxu0 %v1607_v12 }
 0x32e   :  { %1496 = vmatprep.subr.bf16.mxu0 %v1670_v0 }
 0x331   :  { %1497 = vmatpush3.bf16.msra.mxu0 %v1608_v27 }
 0x332   :  { %1498 = vmatprep.subr.bf16.mxu0 %v1670_v0 }
 0x335   :  { %1499 = vmatpush3.bf16.msra.mxu0 %v1609_v28 }
 0x336   :  { %1500 = vmatprep.subr.bf16.mxu0 %v1670_v0 }
 0x339   :  { %1501 = vmatpush3.bf16.msra.mxu0 %v1610_v29 }
 0x33a   :  { %1502 = vmatprep.subr.bf16.mxu0 %v1670_v0 }
 0x33d   :  { %1503 = vmatpush3.bf16.msra.mxu0 %v1611_v30 }
 0x33e   :  { %1504 = vmatprep.subr.bf16.mxu0 %v1670_v0 }
 0x341   :  { %1505 = vmatpush3.bf16.msra.mxu0 %v1612_v31 }
 0x342   :  { %1506 = vmatprep.subr.bf16.mxu0 %v1670_v0 }
 0x345   :  { %1507 = vmatpush3.bf16.msra.mxu0 %v1613_v32  ;;  %v1622_v32 = vld [vmem:[%s2125_s5 + $0x80] sm:$0xff]  }
 0x346   :  { %1532 = vmatprep.subr.bf16.mxu0 %v1670_v0 }
 0x3fb   :  { %v430_v35 = vpop.f32.mrb[4].mxu0 }
 0x3fc   :  { %v431_v36 = vadd.f32 %v1218_v34, %v430_v35  ;;  %v1470_v37 = vpop.f32.mrb[5].mxu0 }
 0x3fd   :  { %v433_v38 = vpop.f32.mrb[6].mxu0 }
 0x3fe   :  { %v437_v39 = vadd.f32 %v431_v36, %v1812_v51  ;;  %v434_v40 = vadd.f32 %v1218_v34, %v433_v38  ;;  %v1471_v41 = vpop.f32.mrb[7].mxu0  ;;  %v1602_v51 = vld [vmem:[%s2123_s3 + $0x60] sm:$0xff]  }
 0x3ff   :  { %1481 = vmatpush3.bf16.msra.mxu1 %v1602_v51 }
 0x400   :  { %v439_v42 = vmax.f32 %v437_v39, 0.0  ;;  %v438_v43 = vadd.f32 %v434_v40, %v1816_v52  ;;  %v1603_v52 = vld [vmem:[%s2123_s3 + $0x68] sm:$0xff]   ;;  %1482 = vmatprep.subr.bf16.mxu1 %v1670_v0 }
 0x402   :  { %v440_v44 = vmax.f32 %v438_v43, 0.0  ;;  %v441_v45 = vsel %vm35_vm1, 0.0, %v439_v42 }
 0x403   :  { %v443_v46 = vmul.f32 %v441_v45, %v441_v45  ;;  %1483 = vmatpush3.bf16.msra.mxu1 %v1603_v52  ;;  %v1614_v52 = vld [vmem:[%s2123_s3 + $0x80] sm:$0xff]  }
 0x404   :  { %v442_v47 = vsel %vm35_vm1, 0.0, %v440_v44  ;;  %1484 = vmatprep.subr.bf16.mxu1 %v1670_v0 }
 0x405   :  { %445 = vadd.xlane.f32.xlu0 %v443_v46  ;;  %v444_v48 = vmul.f32 %v442_v47, %v442_v47 }
 0x407   :  { %447 = vadd.xlane.f32.xlu1 %v444_v48  ;;  %1485 = vmatpush3.bf16.msra.mxu1 %v1604_v53  ;;  %v1615_v53 = vld [vmem:[%s2123_s3 + $0x88] sm:$0xff]  }
 0x408   :  { %1486 = vmatprep.subr.bf16.mxu1 %v1670_v0 }
 0x40b   :  { %1487 = vmatpush3.bf16.msra.mxu1 %v1605_v54  ;;  %v1270_v54 = vld [vmem:[%s2127_s6 + $0x1] ss:$0 sm:$0xff] }
 0x40c   :  { %1512 = vmatprep.subr.bf16.mxu1 %v1670_v0 }
 0x492   :  { %v446_v55 = vpop.xlane.xlu0 %445 }
 0x493   :  { %v449_v56 = vadd.f32 1.0, %v446_v55 }
 0x494   :  { %v448_v57 = vpop.xlane.xlu1 %447 }
 0x495   :  { %v451_v58 = vmax.f32 %v449_v56, 1e-08  ;;  %v450_v59 = vadd.f32 1.0, %v448_v57 }
 0x497   :  { %1646 = vrsqrt.f32 %v451_v58  ;;  %v452_v60 = vmax.f32 %v450_v59, 1e-08  ;;  %vm455_vm10 = vcmp.eq.f32.partialorder %v451_v58, inf  ;;  %v458_v1 = vand.u32 2147483648, %v451_v58 }
 0x498   :  { %vm457_vm11 = vcmp.eq.f32.partialorder %v451_v58, 0.0 }
 0x499   :  { %1648 = vrsqrt.f32 %v452_v60  ;;  %vm462_vm12 = vcmp.eq.f32.partialorder %v452_v60, inf  ;;  %v465_v5 = vand.u32 2147483648, %v452_v60  ;;  %vm464_vm13 = vcmp.eq.f32.partialorder %v452_v60, 0.0 }
 0x4a1   :  { %v1647_v61 = vpop.eup %1646 }
 0x4a2   :  { %v454_v62 = vmul.f32 %v1647_v61, %v451_v58 }
 0x4a3   :  { %v1649_v63 = vpop.eup %1648 }
 0x4a4   :  { %v456_v2 = vsel %vm455_vm10, %v451_v58, %v454_v62  ;;  %v461_v3 = vmul.f32 %v1649_v63, %v452_v60 }
 0x4a5   :  { %v459_v4 = vsel %vm457_vm11, %v458_v1, %v456_v2 }
 0x4a6   :  { %v463_v6 = vsel %vm462_vm12, %v452_v60, %v461_v3  ;;  %v1910_v8 = vsel %vm35_vm1, %v459_v4, %v439_v42 }
 0x4a7   :  { %v466_v7 = vsel %vm464_vm13, %v465_v5, %v463_v6  ;;  %v1616_v6 = vld [vmem:[%s2123_s3 + $0x90] sm:$0xff]  }
 0x4a8   :  { %v1914_v9 = vsel %vm35_vm1, %v466_v7, %v440_v44  ;;  %v1617_v7 = vld [vmem:[%s2123_s3 + $0x98] sm:$0xff]  }
 0x4a9   :  { %v507_v10 = vpack.c.bf16 %v1914_v9, %v1910_v8 }
 0x4ab   :  { %1489 = vmatmul.mubr.bf16.vlgmr.msra.gmra.mrb[4].mxu1 %v507_v10  ;;  %v1620_v10 = vld [vmem:[%s2123_s3 + $0xb0] sm:$0xff]  }
 0x4ac   :  { %1528 = vmatprep.mubr.msk.bf16.mxu1 %vm1671_vm0, %v1670_v0  ;;  %1513 = vmatpush3.bf16.msra.mxu1 %v1614_v52  ;;  %v1629_v52 = vld [vmem:[%s2125_s5 + $0xb8] sm:$0xff]  }
 0x4ad   :  { %1514 = vmatprep.subr.bf16.mxu1 %v1670_v0 }
 0x4b0   :  { %1515 = vmatpush3.bf16.msra.mxu1 %v1615_v53 }
 0x4b1   :  { %1516 = vmatprep.subr.bf16.mxu1 %v1670_v0 }
 0x4b4   :  { %1517 = vmatpush3.bf16.msra.mxu1 %v1616_v6 }
 0x4b5   :  { %1518 = vmatprep.subr.bf16.mxu1 %v1670_v0 }
 0x4b8   :  { %1519 = vmatpush3.bf16.msra.mxu1 %v1617_v7 }
 0x4b9   :  { %1520 = vmatprep.subr.bf16.mxu1 %v1670_v0 }
 0x57e   :  { %v596_v14 = vpop.f32.mrb[4].mxu1 }
 0x57f   :  { %v597_v15 = vadd.f32 %v1261_v13, %v596_v14  ;;  %v1490_v17 = vpop.f32.mrb[5].mxu1 }
 0x580   :  { %v599_v18 = vpop.f32.mrb[6].mxu1 }
 0x581   :  { %v603_v19 = vmax.f32 %v597_v15, 0.0  ;;  %v600_v20 = vadd.f32 %v1261_v13, %v599_v18  ;;  %v1491_v21 = vpop.f32.mrb[7].mxu1 }
 0x583   :  { %v604_v22 = vmax.f32 %v600_v20, 0.0  ;;  %v605_v23 = vsel %vm35_vm1, 0.0, %v603_v19 }
 0x584   :  { %v607_v24 = vmul.f32 %v605_v23, %v605_v23 }
 0x585   :  { %v606_v25 = vsel %vm35_vm1, 0.0, %v604_v22 }
 0x586   :  { %609 = vadd.xlane.f32.xlu0 %v607_v24  ;;  %v608_v26 = vmul.f32 %v606_v25, %v606_v25 }
 0x588   :  { %611 = vadd.xlane.f32.xlu1 %v608_v26 }
 0x613   :  { %v610_v33 = vpop.xlane.xlu0 %609 }
 0x614   :  { %v613_v34 = vadd.f32 1.0, %v610_v33  ;;  %v1623_v33 = vld [vmem:[%s2125_s5 + $0x88] sm:$0xff]  }
 0x615   :  { %v612_v35 = vpop.xlane.xlu1 %611 }
 0x616   :  { %v615_v36 = vmax.f32 %v613_v34, 1e-08  ;;  %v614_v37 = vadd.f32 1.0, %v612_v35  ;;  %v1313_v34 = vld [vmem:[%s2126_s4 + $0x2] ss:$0 sm:$0xff] }
 0x618   :  { %1650 = vrsqrt.f32 %v615_v36  ;;  %v616_v38 = vmax.f32 %v614_v37, 1e-08  ;;  %vm619_vm14 = vcmp.eq.f32.partialorder %v615_v36, inf  ;;  %v622_v42 = vand.u32 2147483648, %v615_v36 }
 0x619   :  { %vm621_vm15 = vcmp.eq.f32.partialorder %v615_v36, 0.0 }
 0x61a   :  { %1652 = vrsqrt.f32 %v616_v38  ;;  %vm626_vm2 = vcmp.eq.f32.partialorder %v616_v38, inf  ;;  %v629_v46 = vand.u32 2147483648, %v616_v38  ;;  %vm628_vm3 = vcmp.eq.f32.partialorder %v616_v38, 0.0 }
 0x622   :  { %v1651_v39 = vpop.eup %1650 }
 0x623   :  { %v618_v40 = vmul.f32 %v1651_v39, %v615_v36 }
 0x624   :  { %v1653_v41 = vpop.eup %1652 }
 0x625   :  { %v620_v43 = vsel %vm619_vm14, %v615_v36, %v618_v40  ;;  %v625_v44 = vmul.f32 %v1653_v41, %v616_v38 }
 0x626   :  { %v623_v45 = vsel %vm621_vm15, %v622_v42, %v620_v43 }
 0x627   :  { %v627_v47 = vsel %vm626_vm2, %v616_v38, %v625_v44  ;;  %v631_v49 = vsel %vm35_vm1, %v623_v45, %v603_v19 }
 0x628   :  { %v630_v48 = vsel %vm628_vm3, %v629_v46, %v627_v47  ;;  %v1624_v47 = vld [vmem:[%s2125_s5 + $0x90] sm:$0xff]  }
 0x629   :  { %v632_v50 = vsel %vm35_vm1, %v630_v48, %v604_v22  ;;  %v1625_v48 = vld [vmem:[%s2125_s5 + $0x98] sm:$0xff]  }
 0x62a   :  { %v633_v51 = vpack.c.bf16 %v632_v50, %v631_v49  ;;  %v1626_v49 = vld [vmem:[%s2125_s5 + $0xa0] sm:$0xff]   ;;  %v1627_v50 = vld [vmem:[%s2125_s5 + $0xa8] sm:$0xff]  }
 0x62c   :  { %1509 = vmatmul.mubr.bf16.vlgmr.msra.gmra.mrb[8].mxu0 %v633_v51  ;;  %v1628_v51 = vld [vmem:[%s2125_s5 + $0xb0] sm:$0xff]  }
 0x62d   :  { %1548 = vmatprep.mubr.msk.bf16.mxu0 %vm1671_vm0, %v1670_v0  ;;  %1533 = vmatpush3.bf16.msra.mxu0 %v1622_v32  ;;  %v1637_v32 = vld [vmem:[%s2128_s7 + $0x38] sm:$0xff]  }
 0x62e   :  { %1534 = vmatprep.subr.bf16.mxu0 %v1670_v0 }
 0x631   :  { %1535 = vmatpush3.bf16.msra.mxu0 %v1623_v33 }
 0x632   :  { %1536 = vmatprep.subr.bf16.mxu0 %v1670_v0 }
 0x635   :  { %1537 = vmatpush3.bf16.msra.mxu0 %v1624_v47 }
 0x636   :  { %1538 = vmatprep.subr.bf16.mxu0 %v1670_v0 }
 0x639   :  { %1539 = vmatpush3.bf16.msra.mxu0 %v1625_v48 }
 0x63a   :  { %1540 = vmatprep.subr.bf16.mxu0 %v1670_v0 }
 0x63d   :  { %1541 = vmatpush3.bf16.msra.mxu0 %v1626_v49 }
 0x63e   :  { %1542 = vmatprep.subr.bf16.mxu0 %v1670_v0 }
 0x641   :  { %1543 = vmatpush3.bf16.msra.mxu0 %v1627_v50 }
 0x642   :  { %1544 = vmatprep.subr.bf16.mxu0 %v1670_v0 }
 0x645   :  { %1545 = vmatpush3.bf16.msra.mxu0 %v1628_v51  ;;  %v1331_v51 = vld [vmem:[%s2129_s8] ss:$0 sm:$0xff] }
 0x646   :  { %1546 = vmatprep.subr.bf16.mxu0 %v1670_v0 }
 0x649   :  { %1547 = vmatpush3.bf16.msra.mxu0 %v1629_v52 }
 0x6ff   :  { %v722_v55 = vpop.f32.mrb[8].mxu0 }
 0x700   :  { %v723_v56 = vadd.f32 %v1270_v54, %v722_v55  ;;  %v1510_v57 = vpop.f32.mrb[9].mxu0 }
 0x701   :  { %v725_v58 = vpop.f32.mrb[10].mxu0 }
 0x702   :  { %v729_v59 = vadd.f32 %v723_v56, %v1910_v8  ;;  %v726_v60 = vadd.f32 %v1270_v54, %v725_v58  ;;  %v1511_v61 = vpop.f32.mrb[11].mxu0  ;;  %v1618_v8 = vld [vmem:[%s2123_s3 + $0xa0] sm:$0xff]  }
 0x703   :  { %1521 = vmatpush3.bf16.msra.mxu1 %v1618_v8 }
 0x704   :  { %v731_v62 = vmax.f32 %v729_v59, 0.0  ;;  %v730_v63 = vadd.f32 %v726_v60, %v1914_v9  ;;  %v1619_v9 = vld [vmem:[%s2123_s3 + $0xa8] sm:$0xff]   ;;  %1522 = vmatprep.subr.bf16.mxu1 %v1670_v0 }
 0x706   :  { %v732_v1 = vmax.f32 %v730_v63, 0.0  ;;  %v733_v2 = vsel %vm35_vm1, 0.0, %v731_v62 }
 0x707   :  { %v735_v3 = vmul.f32 %v733_v2, %v733_v2  ;;  %1523 = vmatpush3.bf16.msra.mxu1 %v1619_v9  ;;  %v1630_v9 = vld [vmem:[%s2128_s7] sm:$0xff]  }
 0x708   :  { %v734_v4 = vsel %vm35_vm1, 0.0, %v732_v1  ;;  %1524 = vmatprep.subr.bf16.mxu1 %v1670_v0 }
 0x709   :  { %737 = vadd.xlane.f32.xlu0 %v735_v3  ;;  %v736_v5 = vmul.f32 %v734_v4, %v734_v4 }
 0x70b   :  { %739 = vadd.xlane.f32.xlu1 %v736_v5  ;;  %1525 = vmatpush3.bf16.msra.mxu1 %v1620_v10  ;;  %v1631_v10 = vld [vmem:[%s2128_s7 + $0x8] sm:$0xff]  }
 0x70c   :  { %1526 = vmatprep.subr.bf16.mxu1 %v1670_v0 }
 0x70f   :  { %1527 = vmatpush3.bf16.msra.mxu1 %v1621_v11  ;;  %v1322_v11 = vld [vmem:[%s2127_s6 + $0x2] ss:$0 sm:$0xff] }
 0x710   :  { %1552 = vmatprep.subr.bf16.mxu1 %v1670_v0 }
 0x796   :  { %v738_v12 = vpop.xlane.xlu0 %737 }
 0x797   :  { %v741_v13 = vadd.f32 1.0, %v738_v12 }
 0x798   :  { %v740_v14 = vpop.xlane.xlu1 %739 }
 0x799   :  { %v743_v15 = vmax.f32 %v741_v13, 1e-08  ;;  %v742_v17 = vadd.f32 1.0, %v740_v14 }
 0x79b   :  { %1654 = vrsqrt.f32 %v743_v15  ;;  %v744_v18 = vmax.f32 %v742_v17, 1e-08  ;;  %vm747_vm4 = vcmp.eq.f32.partialorder %v743_v15, inf  ;;  %v750_v22 = vand.u32 2147483648, %v743_v15 }
 0x79c   :  { %vm749_vm5 = vcmp.eq.f32.partialorder %v743_v15, 0.0 }
 0x79d   :  { %1656 = vrsqrt.f32 %v744_v18  ;;  %vm754_vm6 = vcmp.eq.f32.partialorder %v744_v18, inf  ;;  %v757_v26 = vand.u32 2147483648, %v744_v18  ;;  %vm756_vm7 = vcmp.eq.f32.partialorder %v744_v18, 0.0 }
 0x7a5   :  { %v1655_v19 = vpop.eup %1654 }
 0x7a6   :  { %v746_v20 = vmul.f32 %v1655_v19, %v743_v15 }
 0x7a7   :  { %v1657_v21 = vpop.eup %1656 }
 0x7a8   :  { %v748_v23 = vsel %vm747_vm4, %v743_v15, %v746_v20  ;;  %v753_v24 = vmul.f32 %v1657_v21, %v744_v18 }
 0x7a9   :  { %v751_v25 = vsel %vm749_vm5, %v750_v22, %v748_v23 }
 0x7aa   :  { %v755_v27 = vsel %vm754_vm6, %v744_v18, %v753_v24  ;;  %v2008_v29 = vsel %vm35_vm1, %v751_v25, %v731_v62 }
 0x7ab   :  { %v758_v28 = vsel %vm756_vm7, %v757_v26, %v755_v27  ;;  %v1632_v27 = vld [vmem:[%s2128_s7 + $0x10] sm:$0xff]  }
 0x7ac   :  { %v2012_v30 = vsel %vm35_vm1, %v758_v28, %v732_v1  ;;  %v1633_v28 = vld [vmem:[%s2128_s7 + $0x18] sm:$0xff]  }
 0x7ad   :  { %v799_v31 = vpack.c.bf16 %v2012_v30, %v2008_v29 }
 0x7af   :  { %1529 = vmatmul.mubr.bf16.vlgmr.msra.gmra.mrb[8].mxu1 %v799_v31  ;;  %v1636_v31 = vld [vmem:[%s2128_s7 + $0x30] sm:$0xff]  }
 0x7b0   :  { %1568 = vmatprep.mubr.msk.bf16.mxu1 %vm1671_vm0, %v1670_v0  ;;  %1553 = vmatpush3.bf16.msra.mxu1 %v1630_v9 }
 0x7b1   :  { %1554 = vmatprep.subr.bf16.mxu1 %v1670_v0 }
 0x7b4   :  { %1555 = vmatpush3.bf16.msra.mxu1 %v1631_v10 }
 0x7b5   :  { %1556 = vmatprep.subr.bf16.mxu1 %v1670_v0 }
 0x7b8   :  { %1557 = vmatpush3.bf16.msra.mxu1 %v1632_v27 }
 0x7b9   :  { %1558 = vmatprep.subr.bf16.mxu1 %v1670_v0 }
 0x7bc   :  { %1559 = vmatpush3.bf16.msra.mxu1 %v1633_v28 }
 0x7bd   :  { %1560 = vmatprep.subr.bf16.mxu1 %v1670_v0 }
 0x882   :  { %v888_v35 = vpop.f32.mrb[8].mxu1 }
 0x883   :  { %v889_v36 = vadd.f32 %v1313_v34, %v888_v35  ;;  %v1530_v37 = vpop.f32.mrb[9].mxu1 }
 0x884   :  { %v891_v38 = vpop.f32.mrb[10].mxu1 }
 0x885   :  { %v895_v39 = vmax.f32 %v889_v36, 0.0  ;;  %v892_v40 = vadd.f32 %v1313_v34, %v891_v38  ;;  %v1531_v41 = vpop.f32.mrb[11].mxu1 }
 0x887   :  { %v896_v42 = vmax.f32 %v892_v40, 0.0  ;;  %v897_v43 = vsel %vm35_vm1, 0.0, %v895_v39 }
 0x888   :  { %v899_v44 = vmul.f32 %v897_v43, %v897_v43 }
 0x889   :  { %v898_v45 = vsel %vm35_vm1, 0.0, %v896_v42 }
 0x88a   :  { %901 = vadd.xlane.f32.xlu0 %v899_v44  ;;  %v900_v46 = vmul.f32 %v898_v45, %v898_v45 }
 0x88c   :  { %903 = vadd.xlane.f32.xlu1 %v900_v46 }
 0x917   :  { %v902_v53 = vpop.xlane.xlu0 %901 }
 0x918   :  { %v905_v54 = vadd.f32 1.0, %v902_v53 }
 0x919   :  { %v904_v55 = vpop.xlane.xlu1 %903 }
 0x91a   :  { %v907_v56 = vmax.f32 %v905_v54, 1e-08  ;;  %v906_v57 = vadd.f32 1.0, %v904_v55 }
 0x91c   :  { %1658 = vrsqrt.f32 %v907_v56  ;;  %v908_v58 = vmax.f32 %v906_v57, 1e-08  ;;  %vm911_vm0 = vcmp.eq.f32.partialorder %v907_v56, inf  ;;  %v914_v62 = vand.u32 2147483648, %v907_v56 }
 0x91d   :  { %vm913_vm8 = vcmp.eq.f32.partialorder %v907_v56, 0.0 }
 0x91e   :  { %1660 = vrsqrt.f32 %v908_v58  ;;  %vm918_vm9 = vcmp.eq.f32.partialorder %v908_v58, inf  ;;  %v921_v3 = vand.u32 2147483648, %v908_v58  ;;  %vm920_vm10 = vcmp.eq.f32.partialorder %v908_v58, 0.0 }
 0x926   :  { %v1659_v59 = vpop.eup %1658 }
 0x927   :  { %v910_v60 = vmul.f32 %v1659_v59, %v907_v56 }
 0x928   :  { %v1661_v61 = vpop.eup %1660 }
 0x929   :  { %v912_v63 = vsel %vm911_vm0, %v907_v56, %v910_v60  ;;  %v917_v1 = vmul.f32 %v1661_v61, %v908_v58 }
 0x92a   :  { %v915_v2 = vsel %vm913_vm8, %v914_v62, %v912_v63 }
 0x92b   :  { %v919_v4 = vsel %vm918_vm9, %v908_v58, %v917_v1  ;;  %v923_v6 = vsel %vm35_vm1, %v915_v2, %v895_v39 }
 0x92c   :  { %v922_v5 = vsel %vm920_vm10, %v921_v3, %v919_v4 }
 0x92d   :  { %v924_v7 = vsel %vm35_vm1, %v922_v5, %v896_v42 }
 0x92e   :  { %v925_v8 = vpack.c.bf16 %v924_v7, %v923_v6 }
 0x930   :  { %1549 = vmatmul.mubr.bf16.vlgmr.msra.gmra.mrb[12].mxu0 %v925_v8 }
 0xa03   :  { %v1014_v12 = vpop.f32.mrb[12].mxu0 }
 0xa04   :  { %v1015_v13 = vadd.f32 %v1322_v11, %v1014_v12  ;;  %v1550_v14 = vpop.f32.mrb[13].mxu0 }
 0xa05   :  { %v1017_v15 = vpop.f32.mrb[14].mxu0 }
 0xa06   :  { %v1021_v17 = vadd.f32 %v1015_v13, %v2008_v29  ;;  %v1018_v18 = vadd.f32 %v1322_v11, %v1017_v15  ;;  %v1551_v19 = vpop.f32.mrb[15].mxu0  ;;  %v1634_v29 = vld [vmem:[%s2128_s7 + $0x20] sm:$0xff]  }
 0xa07   :  { %1561 = vmatpush3.bf16.msra.mxu1 %v1634_v29 }
 0xa08   :  { %v1023_v20 = vmax.f32 %v1021_v17, 0.0  ;;  %v1022_v21 = vadd.f32 %v1018_v18, %v2012_v30  ;;  %v1635_v30 = vld [vmem:[%s2128_s7 + $0x28] sm:$0xff]   ;;  %1562 = vmatprep.subr.bf16.mxu1 %v1670_v0 }
 0xa0a   :  { %v1024_v22 = vmax.f32 %v1022_v21, 0.0  ;;  %v1025_v23 = vsel %vm35_vm1, 0.0, %v1023_v20 }
 0xa0b   :  { %v1027_v24 = vmul.f32 %v1025_v23, %v1025_v23  ;;  %1563 = vmatpush3.bf16.msra.mxu1 %v1635_v30 }
 0xa0c   :  { %v1026_v25 = vsel %vm35_vm1, 0.0, %v1024_v22  ;;  %1564 = vmatprep.subr.bf16.mxu1 %v1670_v0 }
 0xa0d   :  { %1029 = vadd.xlane.f32.xlu0 %v1027_v24  ;;  %v1028_v26 = vmul.f32 %v1026_v25, %v1026_v25 }
 0xa0f   :  { %1031 = vadd.xlane.f32.xlu1 %v1028_v26  ;;  %1565 = vmatpush3.bf16.msra.mxu1 %v1636_v31 }
 0xa10   :  { %1566 = vmatprep.subr.bf16.mxu1 %v1670_v0 }
 0xa13   :  { %1567 = vmatpush3.bf16.msra.mxu1 %v1637_v32 }
 0xa9a   :  { %v1030_v33 = vpop.xlane.xlu0 %1029 }
 0xa9b   :  { %v1033_v34 = vadd.f32 1.0, %v1030_v33 }
 0xa9c   :  { %v1032_v35 = vpop.xlane.xlu1 %1031 }
 0xa9d   :  { %v1035_v36 = vmax.f32 %v1033_v34, 1e-08  ;;  %v1034_v37 = vadd.f32 1.0, %v1032_v35 }
 0xa9f   :  { %1662 = vrsqrt.f32 %v1035_v36  ;;  %v1036_v38 = vmax.f32 %v1034_v37, 1e-08  ;;  %vm1039_vm11 = vcmp.eq.f32.partialorder %v1035_v36, inf  ;;  %v1042_v42 = vand.u32 2147483648, %v1035_v36 }
 0xaa0   :  { %vm1041_vm12 = vcmp.eq.f32.partialorder %v1035_v36, 0.0 }
 0xaa1   :  { %1664 = vrsqrt.f32 %v1036_v38  ;;  %vm1046_vm13 = vcmp.eq.f32.partialorder %v1036_v38, inf  ;;  %v1049_v0 = vand.u32 2147483648, %v1036_v38  ;;  %vm1048_vm14 = vcmp.eq.f32.partialorder %v1036_v38, 0.0 }
 0xaa9   :  { %v1663_v39 = vpop.eup %1662 }
 0xaaa   :  { %v1038_v40 = vmul.f32 %v1663_v39, %v1035_v36 }
 0xaab   :  { %v1665_v41 = vpop.eup %1664 }
 0xaac   :  { %v1040_v43 = vsel %vm1039_vm11, %v1035_v36, %v1038_v40  ;;  %v1045_v44 = vmul.f32 %v1665_v41, %v1036_v38 }
 0xaad   :  { %v1043_v45 = vsel %vm1041_vm12, %v1042_v42, %v1040_v43 }
 0xaae   :  { %v1047_v46 = vsel %vm1046_vm13, %v1036_v38, %v1045_v44  ;;  %v1051_v48 = vsel %vm35_vm1, %v1043_v45, %v1023_v20 }
 0xaaf   :  { %v1050_v47 = vsel %vm1048_vm14, %v1049_v0, %v1047_v46 }
 0xab0   :  { %v1052_v49 = vsel %vm35_vm1, %v1050_v47, %v1024_v22 }
 0xab1   :  { %v1070_v50 = vpack.c.bf16 %v1052_v49, %v1051_v48 }
 0xab3   :  { %1569 = vmatmul.mubr.bf16.vlgmr.msra.gmra.mrb[12].mxu1 %v1070_v50 }
 0xb86   :  { %v1159_v52 = vpop.f32.mrb[12].mxu1 }
 0xb87   :  { %v1160_v53 = vadd.f32 %v1331_v51, %v1159_v52  ;;  %v1570_v54 = vpop.f32.mrb[13].mxu1 }
 0xb88   :  { %v1162_v55 = vpop.f32.mrb[14].mxu1 }
 0xb89   :  { %v1163_v56 = vadd.f32 %v1331_v51, %v1162_v55  ;;  %v1571_v57 = vpop.f32.mrb[15].mxu1  ;;  %v1166_v58 = vsel %vm35_vm1, 0.0, %v1160_v53 }
 0xb8a   :  { %v1168_v59 = vmul.f32 %v1166_v58, %v1166_v58 }
 0xb8b   :  { %v1167_v60 = vsel %vm35_vm1, 0.0, %v1163_v56 }
 0xb8c   :  { %1170 = vadd.xlane.f32.xlu0 %v1168_v59  ;;  %v1169_v61 = vmul.f32 %v1167_v60, %v1167_v60 }
 0xb8e   :  { %1172 = vadd.xlane.f32.xlu1 %v1169_v61 }
 0xc19   :  { %v1171_v62 = vpop.xlane.xlu0 %1170 }
 0xc1a   :  { %v1174_v63 = vadd.f32 1.0, %v1171_v62 }
 0xc1b   :  { %v1173_v1 = vpop.xlane.xlu1 %1172 }
 0xc1c   :  { %v1176_v2 = vmax.f32 %v1174_v63, 1e-08  ;;  %v1175_v3 = vadd.f32 1.0, %v1173_v1 }
 0xc1e   :  { %1666 = vrsqrt.f32 %v1176_v2  ;;  %v1177_v4 = vmax.f32 %v1175_v3, 1e-08  ;;  %vm1180_vm15 = vcmp.eq.f32.partialorder %v1176_v2, inf  ;;  %v1183_v7 = vand.u32 2147483648, %v1176_v2 }
 0xc1f   :  { %vm1182_vm2 = vcmp.eq.f32.partialorder %v1176_v2, 0.0 }
 0xc20   :  { %1668 = vrsqrt.f32 %v1177_v4  ;;  %vm1187_vm3 = vcmp.eq.f32.partialorder %v1177_v4, inf  ;;  %v1190_v13 = vand.u32 2147483648, %v1177_v4  ;;  %vm1189_vm4 = vcmp.eq.f32.partialorder %v1177_v4, 0.0 }
 0xc28   :  { %v1667_v5 = vpop.eup %1666 }
 0xc29   :  { %v1179_v6 = vmul.f32 %v1667_v5, %v1176_v2 }
 0xc2a   :  { %v1669_v8 = vpop.eup %1668 }
 0xc2b   :  { %v1181_v9 = vsel %vm1180_vm15, %v1176_v2, %v1179_v6  ;;  %v1186_v11 = vmul.f32 %v1669_v8, %v1177_v4 }
 0xc2c   :  { %v1184_v10 = vsel %vm1182_vm2, %v1183_v7, %v1181_v9 }
 0xc2d   :  { %v1192_v12 = vsel %vm35_vm1, %v1184_v10, %v1160_v53  ;;  %v1188_v14 = vsel %vm1187_vm3, %v1177_v4, %v1186_v11 }
 0xc2e   :  { %1194 = vst [vmem:[%s2130_s9] sm:$0xff] %v1192_v12  ;;  %v1191_v15 = vsel %vm1189_vm4, %v1190_v13, %v1188_v14 }
 0xc2f   :  { %v1193_v17 = vsel %vm35_vm1, %v1191_v15, %v1163_v56 }
 0xc30   :  { %1195 = vst [vmem:[%s2130_s9 + $0x8] sm:$0xff] %v1193_v17 }

</bundles_post_ra>
